<compile_context>
chip_gen: v6e
topology: v6e:2x2x1
jax: 0.10.0
libtpu: 0.0.40
codegen_flags: <defaults>
</compile_context>

<pallas_src>
import functools

import jax
import jax.numpy as jnp
import numpy as np
from jax.experimental import pallas as pl
from jax.experimental.pallas import tpu as pltpu


def _round_up(x, m):
    return (x + m - 1) // m * m


# ---------------------------------------------------------------------------
# Fused hetero SAGEConv kernel (one edge type, one layer):
#   out = [ReLU]( (A_norm @ X_src) @ W_l^T  +  X_dst @ W_r^T  +  b_l )
# ---------------------------------------------------------------------------
def _sage_conv_kernel(a_ref, xs_ref, xd_ref, wl_ref, wr_ref, b_ref,
                      o_ref, acc_ref, *, apply_relu):
    k = pl.program_id(1)

    @pl.when(k == 0)
    def _init():
        acc_ref[...] = jnp.zeros_like(acc_ref)

    # Mean-aggregation partial sum: (TM, TK) @ (TK, H), bf16 MXU, f32 accumulate.
    acc_ref[...] += jnp.dot(a_ref[...], xs_ref[...],
                            preferred_element_type=jnp.float32)

    @pl.when(k == pl.num_programs(1) - 1)
    def _epilogue():
        agg = acc_ref[...].astype(wl_ref.dtype)
        h = jnp.dot(agg, wl_ref[...], preferred_element_type=jnp.float32)
        h = h + jnp.dot(xd_ref[...], wr_ref[...],
                        preferred_element_type=jnp.float32)
        h = h + b_ref[...].astype(jnp.float32)
        if apply_relu:
            h = jnp.maximum(h, 0.0)
        o_ref[...] = h.astype(o_ref.dtype)   # single fused store per dst tile


def sage_conv_pallas(a_norm, x_src, x_dst, w_l_t, w_r_t, bias, *,
                     apply_relu, tm=128, tk=128, out_dtype=jnp.bfloat16):
    nd, ns = a_norm.shape
    h = x_src.shape[1]
    assert nd % tm == 0 and ns % tk == 0
    kernel = functools.partial(_sage_conv_kernel, apply_relu=apply_relu)
    return pl.pallas_call(
        kernel,
        out_shape=jax.ShapeDtypeStruct((nd, h), out_dtype),
        grid_spec=pltpu.PrefetchScalarGridSpec(
            num_scalar_prefetch=0,
            grid=(nd // tm, ns // tk),
            in_specs=[
                pl.BlockSpec((tm, tk), lambda i, k: (i, k)),   # A_norm tile
                pl.BlockSpec((tk, h), lambda i, k: (k, 0)),    # X_src tile
                pl.BlockSpec((tm, h), lambda i, k: (i, 0)),    # X_dst tile
                pl.BlockSpec((h, h), lambda i, k: (0, 0)),     # W_l^T
                pl.BlockSpec((h, h), lambda i, k: (0, 0)),     # W_r^T
                pl.BlockSpec((1, h), lambda i, k: (0, 0)),     # bias
            ],
            out_specs=pl.BlockSpec((tm, h), lambda i, k: (i, 0)),
            scratch_shapes=[pltpu.VMEM((tm, h), jnp.float32)],
        ),
        compiler_params=pltpu.CompilerParams(
            dimension_semantics=("parallel", "arbitrary")),
    )(a_norm, x_src, x_dst, w_l_t, w_r_t, bias)


def sage_conv_ref(a_norm, x_src, x_dst, w_l_t, w_r_t, bias, *,
                  apply_relu, tm=None, tk=None, out_dtype=jnp.bfloat16):
    # Pure-JAX reference with the same cast points as the kernel.
    del tm, tk
    agg = jnp.dot(a_norm, x_src, preferred_element_type=jnp.float32)
    agg = agg.astype(w_l_t.dtype)
    h = jnp.dot(agg, w_l_t, preferred_element_type=jnp.float32)
    h = h + jnp.dot(x_dst, w_r_t, preferred_element_type=jnp.float32)
    h = h + bias.astype(jnp.float32)
    if apply_relu:
        h = jnp.maximum(h, 0.0)
    return h.astype(out_dtype)


# ---------------------------------------------------------------------------
# Link predictor kernel:  relu(W1_g @ Xg^T + W1_d @ Xd^T + b1) -> W2 -> score
# (edges live on the lane axis => lane-dense (1, E_pad) output, no concat)
# ---------------------------------------------------------------------------
def _predictor_kernel(xg_ref, xd_ref, w1g_ref, w1d_ref, b1_ref, w2_ref, b2_ref,
                      o_ref):
    pre = jnp.dot(w1g_ref[...], xg_ref[...],
                  preferred_element_type=jnp.float32)
    pre = pre + jnp.dot(w1d_ref[...], xd_ref[...],
                        preferred_element_type=jnp.float32)
    pre = pre + b1_ref[...].astype(jnp.float32)        # (H, 1) bcast over lanes
    hidden = jnp.maximum(pre, 0.0).astype(w2_ref.dtype)
    s = jnp.dot(w2_ref[...], hidden, preferred_element_type=jnp.float32)
    s = s + b2_ref[...].astype(jnp.float32)            # (1, 1) bcast
    o_ref[...] = s.astype(o_ref.dtype)


def link_predictor_pallas(xg_t, xd_t, w1_g, w1_d, b1, w2, b2, *, te=128):
    h, e_pad = xg_t.shape
    assert e_pad % te == 0
    return pl.pallas_call(
        _predictor_kernel,
        out_shape=jax.ShapeDtypeStruct((1, e_pad), jnp.float32),
        grid_spec=pltpu.PrefetchScalarGridSpec(
            num_scalar_prefetch=0,
            grid=(e_pad // te,),
            in_specs=[
                pl.BlockSpec((h, te), lambda i: (0, i)),   # gathered gene rows^T
                pl.BlockSpec((h, te), lambda i: (0, i)),   # gathered disease rows^T
                pl.BlockSpec((h, h), lambda i: (0, 0)),    # W1_g
                pl.BlockSpec((h, h), lambda i: (0, 0)),    # W1_d
                pl.BlockSpec((h, 1), lambda i: (0, 0)),    # b1
                pl.BlockSpec((1, h), lambda i: (0, 0)),    # W2
                pl.BlockSpec((1, 1), lambda i: (0, 0)),    # b2
            ],
            out_specs=pl.BlockSpec((1, te), lambda i: (0, i)),
        ),
        compiler_params=pltpu.CompilerParams(
            dimension_semantics=("parallel",)),
    )(xg_t, xd_t, w1_g, w1_d, b1, w2, b2)


def link_predictor_ref(xg_t, xd_t, w1_g, w1_d, b1, w2, b2, *, te=None):
    del te
    pre = jnp.dot(w1_g, xg_t, preferred_element_type=jnp.float32)
    pre = pre + jnp.dot(w1_d, xd_t, preferred_element_type=jnp.float32)
    pre = pre + b1.astype(jnp.float32)
    hidden = jnp.maximum(pre, 0.0).astype(w2.dtype)
    s = jnp.dot(w2, hidden, preferred_element_type=jnp.float32)
    return s + b2.astype(jnp.float32)


# ---------------------------------------------------------------------------
# Full model forward (mirrors PyTorch Model.forward)
# ---------------------------------------------------------------------------
def model_forward(params, gene_x, edge_index, edge_label_index,
                  num_genes, num_diseases, *, hidden, use_pallas=True,
                  tm=128, tk=128, te=128, compute_dtype=jnp.bfloat16):
    f32 = jnp.float32

    # ---- input encoders ---------------------------------------------------
    wg, bg = params["gene_lin_w"], params["gene_lin_b"]
    # gene_lin is a K=2 matmul: keep it off the MXU (two VPU broadcast MACs).
    x_gene0 = (gene_x[:, 0:1] * wg[:, 0][None, :]
               + gene_x[:, 1:2] * wg[:, 1][None, :]
               + bg[None, :])
    x_dis0 = params["disease_emb"]          # Embedding(arange(N)) == the table

    g_pad = _round_up(num_genes, max(tm, tk))
    d_pad = _round_up(num_diseases, max(tm, tk))

    def pad_rows(x, n):
        return jnp.pad(x, ((0, n - x.shape[0]), (0, 0)))

    xg = pad_rows(x_gene0, g_pad).astype(compute_dtype)
    xd = pad_rows(x_dis0, d_pad).astype(compute_dtype)

    # Row-normalized dense mean-aggregation adjacencies; deg==0 rows -> all 0,
    # matching PyG SAGEConv "mean" for isolated destination nodes.
    # TODO(synk): for realistically sparse graphs replace the dense adjacency
    # matmul with a CSR / padded-neighbor gather kernel using scalar-prefetched
    # neighbor indices (PrefetchScalarGridSpec + pl.Element / manual DMA).
    def mean_adj(dst_idx, src_idx, n_dst_pad, n_src_pad):
        a = jnp.zeros((n_dst_pad, n_src_pad), f32)
        a = a.at[dst_idx, src_idx].add(1.0)
        deg = a.sum(axis=1, keepdims=True)
        a = a * jnp.where(deg > 0, 1.0 / jnp.maximum(deg, 1.0), 0.0)
        return a.astype(compute_dtype)

    src_g, dst_d = edge_index[0], edge_index[1]
    a_d_from_g = mean_adj(dst_d, src_g, d_pad, g_pad)   # gene -> disease
    a_g_from_d = mean_adj(src_g, dst_d, g_pad, d_pad)   # disease -> gene (rev)

    sage = sage_conv_pallas if use_pallas else sage_conv_ref

    def prep(p):
        return (p["w_l"].T.astype(compute_dtype),
                p["w_r"].T.astype(compute_dtype),
                p["b_l"].reshape(1, -1).astype(f32))

    # ---- to_hetero SAGE layer 1 (+ ReLU) -----------------------------------
    # Each node type has exactly ONE incoming edge type in this metadata, so
    # the per-dst-type sum of to_hetero reduces to a single conv output.
    wl, wr, b = prep(params["conv1_g2d"])
    xd1 = sage(a_d_from_g, xg, xd, wl, wr, b, apply_relu=True,
               tm=tm, tk=tk, out_dtype=compute_dtype)
    wl, wr, b = prep(params["conv1_d2g"])
    xg1 = sage(a_g_from_d, xd, xg, wl, wr, b, apply_relu=True,
               tm=tm, tk=tk, out_dtype=compute_dtype)

    # ---- to_hetero SAGE layer 2 --------------------------------------------
    wl, wr, b = prep(params["conv2_g2d"])
    xd2 = sage(a_d_from_g, xg1, xd1, wl, wr, b, apply_relu=False,
               tm=tm, tk=tk, out_dtype=compute_dtype)
    wl, wr, b = prep(params["conv2_d2g"])
    xg2 = sage(a_g_from_d, xd1, xg1, wl, wr, b, apply_relu=False,
               tm=tm, tk=tk, out_dtype=compute_dtype)

    # ---- link predictor ----------------------------------------------------
    row, col = edge_label_index[0], edge_label_index[1]
    num_edges = row.shape[0]
    e_pad = _round_up(num_edges, te)

    # TODO(synk): a production kernel would DMA-gather these rows in-kernel via
    # scalar-prefetched edge indices instead of an XLA gather in the wrapper.
    def gather_t(x, idx):
        g = jnp.take(x, idx, axis=0)          # (E, H)   XLA gather
        g = jnp.swapaxes(g, 0, 1)             # (H, E)   edges -> lane axis
        return jnp.pad(g, ((0, 0), (0, e_pad - num_edges)))

    xg_t = gather_t(xg2, row).astype(compute_dtype)
    xd_t = gather_t(xd2, col).astype(compute_dtype)

    p = params["predictor"]
    w1_g = p["w1"][:, :hidden].astype(compute_dtype)
    w1_d = p["w1"][:, hidden:].astype(compute_dtype)
    b1 = p["b1"].reshape(hidden, 1).astype(f32)
    w2 = p["w2"].astype(compute_dtype)        # (1, H)
    b2 = p["b2"].reshape(1, 1).astype(f32)

    predictor = link_predictor_pallas if use_pallas else link_predictor_ref
    scores = predictor(xg_t, xd_t, w1_g, w1_d, b1, w2, b2, te=te)
    return scores[0, :num_edges]              # == x.squeeze()


# ---------------------------------------------------------------------------
# Parameter init (mirrors the PyTorch module's parameter set, per edge type)
# ---------------------------------------------------------------------------
def init_params(key, hidden, num_diseases):
    keys = iter(jax.random.split(key, 24))

    def lin_w(out_dim, in_dim):
        return (jax.random.normal(next(keys), (out_dim, in_dim), jnp.float32)
                / np.sqrt(in_dim))

    def vec(dim, scale=0.1):
        return jax.random.normal(next(keys), (dim,), jnp.float32) * scale

    def sage_params():
        return {"w_l": lin_w(hidden, hidden),
                "w_r": lin_w(hidden, hidden),
                "b_l": vec(hidden)}

    return {
        "gene_lin_w": lin_w(hidden, 2),
        "gene_lin_b": vec(hidden),
        "disease_emb": jax.random.normal(next(keys), (num_diseases, hidden),
                                         jnp.float32),
        "conv1_g2d": sage_params(),
        "conv1_d2g": sage_params(),
        "conv2_g2d": sage_params(),
        "conv2_d2g": sage_params(),
        "predictor": {
            "w1": lin_w(hidden, 2 * hidden),
            "b1": vec(hidden),
            "w2": lin_w(1, hidden),
            "b2": vec(1),
        },
    }


if __name__ == "__main__":
    HIDDEN = 32
    NUM_GENES = 200
    NUM_DISEASES = 150
    NUM_MSG_EDGES = 600
    NUM_LABEL_EDGES = 300

    key = jax.random.PRNGKey(0)
    k_feat, k_ms, k_md, k_ls, k_ld, k_params = jax.random.split(key, 6)

    gene_x = jax.random.normal(k_feat, (NUM_GENES, 2), jnp.float32)
    edge_index = jnp.stack([
        jax.random.randint(k_ms, (NUM_MSG_EDGES,), 0, NUM_GENES),
        jax.random.randint(k_md, (NUM_MSG_EDGES,), 0, NUM_DISEASES)])
    edge_label_index = jnp.stack([
        jax.random.randint(k_ls, (NUM_LABEL_EDGES,), 0, NUM_GENES),
        jax.random.randint(k_ld, (NUM_LABEL_EDGES,), 0, NUM_DISEASES)])

    params = init_params(k_params, HIDDEN, NUM_DISEASES)

    fwd = functools.partial(model_forward,
                            num_genes=NUM_GENES,
                            num_diseases=NUM_DISEASES,
                            hidden=HIDDEN)

    scores = jax.jit(functools.partial(fwd, use_pallas=True))(
        params, gene_x, edge_index, edge_label_index)
    scores = jax.block_until_ready(scores)

    ref = jax.jit(functools.partial(fwd, use_pallas=False))(
        params, gene_x, edge_index, edge_label_index)
    ref = jax.block_until_ready(ref)

    assert scores.shape == (NUM_LABEL_EDGES,)
    assert bool(jnp.all(jnp.isfinite(scores)))
    np.testing.assert_allclose(np.asarray(scores, np.float32),
                               np.asarray(ref, np.float32),
                               rtol=5e-2, atol=5e-2)
    print("KERNEL_OK")
</pallas_src>

<mosaic_0001>
module attributes {stable_mosaic.version = 11 : i64} {
  func.func private @main(%arg0: i32) attributes {dimension_semantics = [#tpu.dimension_semantics<core_parallel>], iteration_bounds = array<i64: 2>, tpu.core_type = #tpu.core_type<sc_scalar_subcore>, window_params = []} {
    return
  }
}

module attributes {stable_mosaic.version = 11 : i64} {
  func.func private @main(%arg0: i32) attributes {dimension_semantics = [#tpu.dimension_semantics<core_parallel>], iteration_bounds = array<i64: 2>, tpu.core_type = #tpu.core_type<sc_scalar_subcore>, window_params = []} {
    return
  }
}

module attributes {stable_mosaic.version = 11 : i64} {
  func.func @_sage_conv_kernel(%arg0: i32, %arg1: i32, %arg2: memref<128x128xbf16, #tpu.memory_space<vmem>>, %arg3: memref<128x32xbf16, #tpu.memory_space<vmem>>, %arg4: memref<128x32xbf16, #tpu.memory_space<vmem>>, %arg5: memref<32x32xbf16, #tpu.memory_space<vmem>>, %arg6: memref<32x32xbf16, #tpu.memory_space<vmem>>, %arg7: memref<1x32xf32, #tpu.memory_space<vmem>>, %arg8: memref<128x32xbf16, #tpu.memory_space<vmem>>, %arg9: memref<128x32xf32, #tpu.memory_space<vmem>>) attributes {dimension_semantics = [#tpu.dimension_semantics<parallel>, #tpu.dimension_semantics<arbitrary>], iteration_bounds = array<i64: 2, 2>, scalar_prefetch = 0 : i64, scratch_operands = 1 : i64, tpu.core_type = #tpu.core_type<tc>, window_params = [{transform_indices = @transform_0, window_bounds = array<i64: 128, 128>}, {transform_indices = @transform_1, window_bounds = array<i64: 128, 32>}, {transform_indices = @transform_2, window_bounds = array<i64: 128, 32>}, {pipeline_mode = #tpu.pipeline_mode<synchronous>, transform_indices = @transform_3, window_bounds = array<i64: 32, 32>}, {pipeline_mode = #tpu.pipeline_mode<synchronous>, transform_indices = @transform_4, window_bounds = array<i64: 32, 32>}, {pipeline_mode = #tpu.pipeline_mode<synchronous>, transform_indices = @transform_5, window_bounds = array<i64: 1, 32>}, {transform_indices = @transform_6, window_bounds = array<i64: 128, 32>}]} {
    %c0_i32 = arith.constant 0 : i32
    %0 = arith.cmpi eq, %arg1, %c0_i32 : i32
    %1 = arith.extui %0 : i1 to i32
    %c0_i32_0 = arith.constant 0 : i32
    %2 = arith.cmpi ne, %1, %c0_i32_0 : i32
    scf.if %2 {
      %cst_9 = arith.constant 0.000000e+00 : f32
      %12 = vector.broadcast %cst_9 : f32 to vector<128x32xf32>
      %c0_10 = arith.constant 0 : index
      %c0_11 = arith.constant 0 : index
      %13 = vector.load %arg9[%c0_10, %c0_11] : memref<128x32xf32, #tpu.memory_space<vmem>>, vector<128x32xf32>
      tpu.vector_store %arg9[%c0_10, %c0_11], %12 {strides = array<i32>} : memref<128x32xf32, #tpu.memory_space<vmem>>, vector<128x32xf32>,
    } else {
    }
    %c0 = arith.constant 0 : index
    %c0_1 = arith.constant 0 : index
    %3 = vector.load %arg9[%c0, %c0_1] : memref<128x32xf32, #tpu.memory_space<vmem>>, vector<128x32xf32>
    %c0_2 = arith.constant 0 : index
    %c0_3 = arith.constant 0 : index
    %4 = vector.load %arg2[%c0_2, %c0_3] : memref<128x128xbf16, #tpu.memory_space<vmem>>, vector<128x128xbf16>
    %c0_4 = arith.constant 0 : index
    %c0_5 = arith.constant 0 : index
    %5 = vector.load %arg3[%c0_4, %c0_5] : memref<128x32xbf16, #tpu.memory_space<vmem>>, vector<128x32xbf16>
    %cst = arith.constant dense<0.000000e+00> : vector<128x32xf32>
    %6 = tpu.matmul %4, %5, %cst {dimension_numbers = #tpu.dot_dimension_numbers<[1], [0], [0], [1], [0, 0, 1, 1], [], []>} : vector<128x128xbf16>, vector<128x32xbf16>, vector<128x32xf32> -> vector<128x32xf32>
    %7 = arith.addf %3, %6 : vector<128x32xf32>
    %c0_6 = arith.constant 0 : index
    %c0_7 = arith.constant 0 : index
    %8 = vector.load %arg9[%c0_6, %c0_7] : memref<128x32xf32, #tpu.memory_space<vmem>>, vector<128x32xf32>
    tpu.vector_store %arg9[%c0_6, %c0_7], %7 {strides = array<i32>} : memref<128x32xf32, #tpu.memory_space<vmem>>, vector<128x32xf32>,
    %c1_i32 = arith.constant 1 : i32
    %9 = arith.cmpi eq, %arg1, %c1_i32 : i32
    %10 = arith.extui %9 : i1 to i32
    %c0_i32_8 = arith.constant 0 : i32
    %11 = arith.cmpi ne, %10, %c0_i32_8 : i32
    scf.if %11 {
      %c0_9 = arith.constant 0 : index
      %c0_10 = arith.constant 0 : index
      %12 = vector.load %arg9[%c0_9, %c0_10] : memref<128x32xf32, #tpu.memory_space<vmem>>, vector<128x32xf32>
      %13 = arith.truncf %12 : vector<128x32xf32> to vector<128x32xbf16>
      %c0_11 = arith.constant 0 : index
      %c0_12 = arith.constant 0 : index
      %14 = vector.load %arg5[%c0_11, %c0_12] : memref<32x32xbf16, #tpu.memory_space<vmem>>, vector<32x32xbf16>
      %cst_13 = arith.constant dense<0.000000e+00> : vector<128x32xf32>
      %15 = tpu.matmul %13, %14, %cst_13 {dimension_numbers = #tpu.dot_dimension_numbers<[1], [0], [0], [1], [0, 0, 1, 1], [], []>} : vector<128x32xbf16>, vector<32x32xbf16>, vector<128x32xf32> -> vector<128x32xf32>
      %c0_14 = arith.constant 0 : index
      %c0_15 = arith.constant 0 : index
      %16 = vector.load %arg4[%c0_14, %c0_15] : memref<128x32xbf16, #tpu.memory_space<vmem>>, vector<128x32xbf16>
      %c0_16 = arith.constant 0 : index
      %c0_17 = arith.constant 0 : index
      %17 = vector.load %arg6[%c0_16, %c0_17] : memref<32x32xbf16, #tpu.memory_space<vmem>>, vector<32x32xbf16>
      %cst_18 = arith.constant dense<0.000000e+00> : vector<128x32xf32>
      %18 = tpu.matmul %16, %17, %cst_18 {dimension_numbers = #tpu.dot_dimension_numbers<[1], [0], [0], [1], [0, 0, 1, 1], [], []>} : vector<128x32xbf16>, vector<32x32xbf16>, vector<128x32xf32> -> vector<128x32xf32>
      %19 = arith.addf %15, %18 : vector<128x32xf32>
      %c0_19 = arith.constant 0 : index
      %c0_20 = arith.constant 0 : index
      %20 = vector.load %arg7[%c0_19, %c0_20] : memref<1x32xf32, #tpu.memory_space<vmem>>, vector<1x32xf32>
      %21 = vector.broadcast %20 : vector<1x32xf32> to vector<128x32xf32>
      %22 = arith.addf %19, %21 : vector<128x32xf32>
      %cst_21 = arith.constant 0.000000e+00 : f32
      %23 = vector.broadcast %cst_21 : f32 to vector<128x32xf32>
      %24 = arith.maximumf %22, %23 : vector<128x32xf32>
      %25 = arith.truncf %24 : vector<128x32xf32> to vector<128x32xbf16>
      %c0_22 = arith.constant 0 : index
      %c0_23 = arith.constant 0 : index
      %26 = vector.load %arg8[%c0_22, %c0_23] : memref<128x32xbf16, #tpu.memory_space<vmem>>, vector<128x32xbf16>
      tpu.vector_store %arg8[%c0_22, %c0_23], %25 {strides = array<i32>} : memref<128x32xbf16, #tpu.memory_space<vmem>>, vector<128x32xbf16>,
    } else {
    }
    return
  }
  func.func @transform_0(%arg0: i32, %arg1: i32) -> (i32, i32) {
    %c0_i32 = arith.constant 0 : i32
    return %arg0, %arg1 : i32, i32
  }
  func.func @transform_1(%arg0: i32, %arg1: i32) -> (i32, i32) {
    %c0_i32 = arith.constant 0 : i32
    %c0_i32_0 = arith.constant 0 : i32
    return %arg1, %c0_i32 : i32, i32
  }
  func.func @transform_2(%arg0: i32, %arg1: i32) -> (i32, i32) {
    %c0_i32 = arith.constant 0 : i32
    %c0_i32_0 = arith.constant 0 : i32
    return %arg0, %c0_i32 : i32, i32
  }
  func.func @transform_3(%arg0: i32, %arg1: i32) -> (i32, i32) {
    %c0_i32 = arith.constant 0 : i32
    %c0_i32_0 = arith.constant 0 : i32
    %c0_i32_1 = arith.constant 0 : i32
    return %c0_i32, %c0_i32_0 : i32, i32
  }
  func.func @transform_4(%arg0: i32, %arg1: i32) -> (i32, i32) {
    %c0_i32 = arith.constant 0 : i32
    %c0_i32_0 = arith.constant 0 : i32
    %c0_i32_1 = arith.constant 0 : i32
    return %c0_i32, %c0_i32_0 : i32, i32
  }
  func.func @transform_5(%arg0: i32, %arg1: i32) -> (i32, i32) {
    %c0_i32 = arith.constant 0 : i32
    %c0_i32_0 = arith.constant 0 : i32
    %c0_i32_1 = arith.constant 0 : i32
    return %c0_i32, %c0_i32_0 : i32, i32
  }
  func.func @transform_6(%arg0: i32, %arg1: i32) -> (i32, i32) {
    %c0_i32 = arith.constant 0 : i32
    %c0_i32_0 = arith.constant 0 : i32
    return %arg0, %c0_i32 : i32, i32
  }
}

module attributes {stable_mosaic.version = 11 : i64} {
  func.func @_sage_conv_kernel(%arg0: i32, %arg1: i32, %arg2: memref<128x128xbf16, #tpu.memory_space<vmem>>, %arg3: memref<128x32xbf16, #tpu.memory_space<vmem>>, %arg4: memref<128x32xbf16, #tpu.memory_space<vmem>>, %arg5: memref<32x32xbf16, #tpu.memory_space<vmem>>, %arg6: memref<32x32xbf16, #tpu.memory_space<vmem>>, %arg7: memref<1x32xf32, #tpu.memory_space<vmem>>, %arg8: memref<128x32xbf16, #tpu.memory_space<vmem>>, %arg9: memref<128x32xf32, #tpu.memory_space<vmem>>) attributes {dimension_semantics = [#tpu.dimension_semantics<parallel>, #tpu.dimension_semantics<arbitrary>], iteration_bounds = array<i64: 2, 2>, scalar_prefetch = 0 : i64, scratch_operands = 1 : i64, tpu.core_type = #tpu.core_type<tc>, window_params = [{transform_indices = @transform_0, window_bounds = array<i64: 128, 128>}, {transform_indices = @transform_1, window_bounds = array<i64: 128, 32>}, {transform_indices = @transform_2, window_bounds = array<i64: 128, 32>}, {pipeline_mode = #tpu.pipeline_mode<synchronous>, transform_indices = @transform_3, window_bounds = array<i64: 32, 32>}, {pipeline_mode = #tpu.pipeline_mode<synchronous>, transform_indices = @transform_4, window_bounds = array<i64: 32, 32>}, {pipeline_mode = #tpu.pipeline_mode<synchronous>, transform_indices = @transform_5, window_bounds = array<i64: 1, 32>}, {transform_indices = @transform_6, window_bounds = array<i64: 128, 32>}]} {
    %c0_i32 = arith.constant 0 : i32
    %0 = arith.cmpi eq, %arg1, %c0_i32 : i32
    %1 = arith.extui %0 : i1 to i32
    %c0_i32_0 = arith.constant 0 : i32
    %2 = arith.cmpi ne, %1, %c0_i32_0 : i32
    scf.if %2 {
      %cst_9 = arith.constant 0.000000e+00 : f32
      %12 = vector.broadcast %cst_9 : f32 to vector<128x32xf32>
      %c0_10 = arith.constant 0 : index
      %c0_11 = arith.constant 0 : index
      %13 = vector.load %arg9[%c0_10, %c0_11] : memref<128x32xf32, #tpu.memory_space<vmem>>, vector<128x32xf32>
      tpu.vector_store %arg9[%c0_10, %c0_11], %12 {strides = array<i32>} : memref<128x32xf32, #tpu.memory_space<vmem>>, vector<128x32xf32>,
    } else {
    }
    %c0 = arith.constant 0 : index
    %c0_1 = arith.constant 0 : index
    %3 = vector.load %arg9[%c0, %c0_1] : memref<128x32xf32, #tpu.memory_space<vmem>>, vector<128x32xf32>
    %c0_2 = arith.constant 0 : index
    %c0_3 = arith.constant 0 : index
    %4 = vector.load %arg2[%c0_2, %c0_3] : memref<128x128xbf16, #tpu.memory_space<vmem>>, vector<128x128xbf16>
    %c0_4 = arith.constant 0 : index
    %c0_5 = arith.constant 0 : index
    %5 = vector.load %arg3[%c0_4, %c0_5] : memref<128x32xbf16, #tpu.memory_space<vmem>>, vector<128x32xbf16>
    %cst = arith.constant dense<0.000000e+00> : vector<128x32xf32>
    %6 = tpu.matmul %4, %5, %cst {dimension_numbers = #tpu.dot_dimension_numbers<[1], [0], [0], [1], [0, 0, 1, 1], [], []>} : vector<128x128xbf16>, vector<128x32xbf16>, vector<128x32xf32> -> vector<128x32xf32>
    %7 = arith.addf %3, %6 : vector<128x32xf32>
    %c0_6 = arith.constant 0 : index
    %c0_7 = arith.constant 0 : index
    %8 = vector.load %arg9[%c0_6, %c0_7] : memref<128x32xf32, #tpu.memory_space<vmem>>, vector<128x32xf32>
    tpu.vector_store %arg9[%c0_6, %c0_7], %7 {strides = array<i32>} : memref<128x32xf32, #tpu.memory_space<vmem>>, vector<128x32xf32>,
    %c1_i32 = arith.constant 1 : i32
    %9 = arith.cmpi eq, %arg1, %c1_i32 : i32
    %10 = arith.extui %9 : i1 to i32
    %c0_i32_8 = arith.constant 0 : i32
    %11 = arith.cmpi ne, %10, %c0_i32_8 : i32
    scf.if %11 {
      %c0_9 = arith.constant 0 : index
      %c0_10 = arith.constant 0 : index
      %12 = vector.load %arg9[%c0_9, %c0_10] : memref<128x32xf32, #tpu.memory_space<vmem>>, vector<128x32xf32>
      %13 = arith.truncf %12 : vector<128x32xf32> to vector<128x32xbf16>
      %c0_11 = arith.constant 0 : index
      %c0_12 = arith.constant 0 : index
      %14 = vector.load %arg5[%c0_11, %c0_12] : memref<32x32xbf16, #tpu.memory_space<vmem>>, vector<32x32xbf16>
      %cst_13 = arith.constant dense<0.000000e+00> : vector<128x32xf32>
      %15 = tpu.matmul %13, %14, %cst_13 {dimension_numbers = #tpu.dot_dimension_numbers<[1], [0], [0], [1], [0, 0, 1, 1], [], []>} : vector<128x32xbf16>, vector<32x32xbf16>, vector<128x32xf32> -> vector<128x32xf32>
      %c0_14 = arith.constant 0 : index
      %c0_15 = arith.constant 0 : index
      %16 = vector.load %arg4[%c0_14, %c0_15] : memref<128x32xbf16, #tpu.memory_space<vmem>>, vector<128x32xbf16>
      %c0_16 = arith.constant 0 : index
      %c0_17 = arith.constant 0 : index
      %17 = vector.load %arg6[%c0_16, %c0_17] : memref<32x32xbf16, #tpu.memory_space<vmem>>, vector<32x32xbf16>
      %cst_18 = arith.constant dense<0.000000e+00> : vector<128x32xf32>
      %18 = tpu.matmul %16, %17, %cst_18 {dimension_numbers = #tpu.dot_dimension_numbers<[1], [0], [0], [1], [0, 0, 1, 1], [], []>} : vector<128x32xbf16>, vector<32x32xbf16>, vector<128x32xf32> -> vector<128x32xf32>
      %19 = arith.addf %15, %18 : vector<128x32xf32>
      %c0_19 = arith.constant 0 : index
      %c0_20 = arith.constant 0 : index
      %20 = vector.load %arg7[%c0_19, %c0_20] : memref<1x32xf32, #tpu.memory_space<vmem>>, vector<1x32xf32>
      %21 = vector.broadcast %20 : vector<1x32xf32> to vector<128x32xf32>
      %22 = arith.addf %19, %21 : vector<128x32xf32>
      %23 = arith.truncf %22 : vector<128x32xf32> to vector<128x32xbf16>
      %c0_21 = arith.constant 0 : index
      %c0_22 = arith.constant 0 : index
      %24 = vector.load %arg8[%c0_21, %c0_22] : memref<128x32xbf16, #tpu.memory_space<vmem>>, vector<128x32xbf16>
      tpu.vector_store %arg8[%c0_21, %c0_22], %23 {strides = array<i32>} : memref<128x32xbf16, #tpu.memory_space<vmem>>, vector<128x32xbf16>,
    } else {
    }
    return
  }
  func.func @transform_0(%arg0: i32, %arg1: i32) -> (i32, i32) {
    %c0_i32 = arith.constant 0 : i32
    return %arg0, %arg1 : i32, i32
  }
  func.func @transform_1(%arg0: i32, %arg1: i32) -> (i32, i32) {
    %c0_i32 = arith.constant 0 : i32
    %c0_i32_0 = arith.constant 0 : i32
    return %arg1, %c0_i32 : i32, i32
  }
  func.func @transform_2(%arg0: i32, %arg1: i32) -> (i32, i32) {
    %c0_i32 = arith.constant 0 : i32
    %c0_i32_0 = arith.constant 0 : i32
    return %arg0, %c0_i32 : i32, i32
  }
  func.func @transform_3(%arg0: i32, %arg1: i32) -> (i32, i32) {
    %c0_i32 = arith.constant 0 : i32
    %c0_i32_0 = arith.constant 0 : i32
    %c0_i32_1 = arith.constant 0 : i32
    return %c0_i32, %c0_i32_0 : i32, i32
  }
  func.func @transform_4(%arg0: i32, %arg1: i32) -> (i32, i32) {
    %c0_i32 = arith.constant 0 : i32
    %c0_i32_0 = arith.constant 0 : i32
    %c0_i32_1 = arith.constant 0 : i32
    return %c0_i32, %c0_i32_0 : i32, i32
  }
  func.func @transform_5(%arg0: i32, %arg1: i32) -> (i32, i32) {
    %c0_i32 = arith.constant 0 : i32
    %c0_i32_0 = arith.constant 0 : i32
    %c0_i32_1 = arith.constant 0 : i32
    return %c0_i32, %c0_i32_0 : i32, i32
  }
  func.func @transform_6(%arg0: i32, %arg1: i32) -> (i32, i32) {
    %c0_i32 = arith.constant 0 : i32
    %c0_i32_0 = arith.constant 0 : i32
    return %arg0, %c0_i32 : i32, i32
  }
}

module attributes {stable_mosaic.version = 11 : i64} {
  func.func @_predictor_kernel(%arg0: i32, %arg1: memref<32x128xbf16, #tpu.memory_space<vmem>>, %arg2: memref<32x128xbf16, #tpu.memory_space<vmem>>, %arg3: memref<32x32xbf16, #tpu.memory_space<vmem>>, %arg4: memref<32x32xbf16, #tpu.memory_space<vmem>>, %arg5: memref<32x1xf32, #tpu.memory_space<vmem>>, %arg6: memref<1x32xbf16, #tpu.memory_space<vmem>>, %arg7: memref<1x1xf32, #tpu.memory_space<vmem>>, %arg8: memref<1x128xf32, #tpu.memory_space<vmem>>) attributes {dimension_semantics = [#tpu.dimension_semantics<parallel>], iteration_bounds = array<i64: 3>, scalar_prefetch = 0 : i64, scratch_operands = 0 : i64, tpu.core_type = #tpu.core_type<tc>, window_params = [{transform_indices = @transform_0, window_bounds = array<i64: 32, 128>}, {transform_indices = @transform_1, window_bounds = array<i64: 32, 128>}, {pipeline_mode = #tpu.pipeline_mode<synchronous>, transform_indices = @transform_2, window_bounds = array<i64: 32, 32>}, {pipeline_mode = #tpu.pipeline_mode<synchronous>, transform_indices = @transform_3, window_bounds = array<i64: 32, 32>}, {pipeline_mode = #tpu.pipeline_mode<synchronous>, transform_indices = @transform_4, window_bounds = array<i64: 32, 1>}, {pipeline_mode = #tpu.pipeline_mode<synchronous>, transform_indices = @transform_5, window_bounds = array<i64: 1, 32>}, {pipeline_mode = #tpu.pipeline_mode<synchronous>, transform_indices = @transform_6, window_bounds = array<i64: 1, 1>}, {transform_indices = @transform_7, window_bounds = array<i64: 1, 128>}]} {
    %c0 = arith.constant 0 : index
    %c0_0 = arith.constant 0 : index
    %0 = vector.load %arg3[%c0, %c0_0] : memref<32x32xbf16, #tpu.memory_space<vmem>>, vector<32x32xbf16>
    %c0_1 = arith.constant 0 : index
    %c0_2 = arith.constant 0 : index
    %1 = vector.load %arg1[%c0_1, %c0_2] : memref<32x128xbf16, #tpu.memory_space<vmem>>, vector<32x128xbf16>
    %cst = arith.constant dense<0.000000e+00> : vector<32x128xf32>
    %2 = tpu.matmul %0, %1, %cst {dimension_numbers = #tpu.dot_dimension_numbers<[1], [0], [0], [1], [0, 0, 1, 1], [], []>} : vector<32x32xbf16>, vector<32x128xbf16>, vector<32x128xf32> -> vector<32x128xf32>
    %c0_3 = arith.constant 0 : index
    %c0_4 = arith.constant 0 : index
    %3 = vector.load %arg4[%c0_3, %c0_4] : memref<32x32xbf16, #tpu.memory_space<vmem>>, vector<32x32xbf16>
    %c0_5 = arith.constant 0 : index
    %c0_6 = arith.constant 0 : index
    %4 = vector.load %arg2[%c0_5, %c0_6] : memref<32x128xbf16, #tpu.memory_space<vmem>>, vector<32x128xbf16>
    %cst_7 = arith.constant dense<0.000000e+00> : vector<32x128xf32>
    %5 = tpu.matmul %3, %4, %cst_7 {dimension_numbers = #tpu.dot_dimension_numbers<[1], [0], [0], [1], [0, 0, 1, 1], [], []>} : vector<32x32xbf16>, vector<32x128xbf16>, vector<32x128xf32> -> vector<32x128xf32>
    %6 = arith.addf %2, %5 : vector<32x128xf32>
    %c0_8 = arith.constant 0 : index
    %c0_9 = arith.constant 0 : index
    %7 = vector.load %arg5[%c0_8, %c0_9] : memref<32x1xf32, #tpu.memory_space<vmem>>, vector<32x1xf32>
    %8 = vector.broadcast %7 : vector<32x1xf32> to vector<32x128xf32>
    %9 = arith.addf %6, %8 : vector<32x128xf32>
    %cst_10 = arith.constant 0.000000e+00 : f32
    %10 = vector.broadcast %cst_10 : f32 to vector<32x128xf32>
    %11 = arith.maximumf %9, %10 : vector<32x128xf32>
    %12 = arith.truncf %11 : vector<32x128xf32> to vector<32x128xbf16>
    %c0_11 = arith.constant 0 : index
    %c0_12 = arith.constant 0 : index
    %13 = vector.load %arg6[%c0_11, %c0_12] : memref<1x32xbf16, #tpu.memory_space<vmem>>, vector<1x32xbf16>
    %cst_13 = arith.constant dense<0.000000e+00> : vector<1x128xf32>
    %14 = tpu.matmul %13, %12, %cst_13 {dimension_numbers = #tpu.dot_dimension_numbers<[1], [0], [0], [1], [0, 0, 1, 1], [], []>} : vector<1x32xbf16>, vector<32x128xbf16>, vector<1x128xf32> -> vector<1x128xf32>
    %c0_14 = arith.constant 0 : index
    %c0_15 = arith.constant 0 : index
    %15 = vector.load %arg7[%c0_14, %c0_15] : memref<1x1xf32, #tpu.memory_space<vmem>>, vector<1x1xf32>
    %16 = vector.broadcast %15 : vector<1x1xf32> to vector<1x128xf32>
    %17 = arith.addf %14, %16 : vector<1x128xf32>
    %c0_16 = arith.constant 0 : index
    %c0_17 = arith.constant 0 : index
    %18 = vector.load %arg8[%c0_16, %c0_17] : memref<1x128xf32, #tpu.memory_space<vmem>>, vector<1x128xf32>
    tpu.vector_store %arg8[%c0_16, %c0_17], %17 {strides = array<i32>} : memref<1x128xf32, #tpu.memory_space<vmem>>, vector<1x128xf32>,
    return
  }
  func.func @transform_0(%arg0: i32) -> (i32, i32) {
    %c0_i32 = arith.constant 0 : i32
    %c0_i32_0 = arith.constant 0 : i32
    return %c0_i32, %arg0 : i32, i32
  }
  func.func @transform_1(%arg0: i32) -> (i32, i32) {
    %c0_i32 = arith.constant 0 : i32
    %c0_i32_0 = arith.constant 0 : i32
    return %c0_i32, %arg0 : i32, i32
  }
  func.func @transform_2(%arg0: i32) -> (i32, i32) {
    %c0_i32 = arith.constant 0 : i32
    %c0_i32_0 = arith.constant 0 : i32
    %c0_i32_1 = arith.constant 0 : i32
    return %c0_i32, %c0_i32_0 : i32, i32
  }
  func.func @transform_3(%arg0: i32) -> (i32, i32) {
    %c0_i32 = arith.constant 0 : i32
    %c0_i32_0 = arith.constant 0 : i32
    %c0_i32_1 = arith.constant 0 : i32
    return %c0_i32, %c0_i32_0 : i32, i32
  }
  func.func @transform_4(%arg0: i32) -> (i32, i32) {
    %c0_i32 = arith.constant 0 : i32
    %c0_i32_0 = arith.constant 0 : i32
    %c0_i32_1 = arith.constant 0 : i32
    return %c0_i32, %c0_i32_0 : i32, i32
  }
  func.func @transform_5(%arg0: i32) -> (i32, i32) {
    %c0_i32 = arith.constant 0 : i32
    %c0_i32_0 = arith.constant 0 : i32
    %c0_i32_1 = arith.constant 0 : i32
    return %c0_i32, %c0_i32_0 : i32, i32
  }
  func.func @transform_6(%arg0: i32) -> (i32, i32) {
    %c0_i32 = arith.constant 0 : i32
    %c0_i32_0 = arith.constant 0 : i32
    %c0_i32_1 = arith.constant 0 : i32
    return %c0_i32, %c0_i32_0 : i32, i32
  }
  func.func @transform_7(%arg0: i32) -> (i32, i32) {
    %c0_i32 = arith.constant 0 : i32
    %c0_i32_0 = arith.constant 0 : i32
    return %c0_i32, %arg0 : i32, i32
  }
}

</mosaic_0001>

<bundles_post_ra>
// kernel: model_forward.5
= control target key start
LH: loop header
LB: loop body
LE: loop exit
PB: predicated region body
PF: predicated region fallthrough
CT: control target
= control target key end

     0   :  { %s1691_s21 = smov 0   ;;  %s1693_s22 = smov 0   ;;  %s1951_s0 = inlined_call_operand.vmem [shape: bf16[256,256], index: 0, kind: input, shape index: {}]   ;;  %s1952_s1 = inlined_call_operand.vmem [shape: bf16[256,32], index: 1, kind: input, shape index: {}]   ;;  %s1953_s2 = inlined_call_operand.vmem [shape: bf16[256,32], index: 2, kind: input, shape index: {}]   ;;  %s1954_s3 = inlined_call_operand.vmem [shape: bf16[32,32], index: 3, kind: input, shape index: {}]   ;;  %s1955_s4 = inlined_call_operand.vmem [shape: bf16[32,32], index: 4, kind: input, shape index: {}]   ;;  %s1956_s5 = inlined_call_operand.vmem [shape: f32[1,32], index: 5, kind: input, shape index: {}]   ;;  %s1957_s6 = inlined_call_operand.vmem [shape: bf16[256,32], index: 6, kind: output, shape index: {}]  }
   0x1   :  { %s1695_s23 = smov 0   ;;  %s1697_s24 = smov 0  }
   0x2   :  { %s1699_s25 = smov 0   ;;  %s1701_s26 = smov 0  }
   0x3   :  { %s1703_s27 = smov 0  }
   0x4 LB: > { %s25_s28 = sadd.s32 1, %s1645_s25  ;;  %s28_s29 = sadd.s32 1, %s1649_s26  ;;  %s1653_s27 = sphi %s1703_s27, %s16_s27   ;;  %s1649_s26 = sphi %s1701_s26, %s1963_s26   ;;  %s1645_s25 = sphi %s1699_s25, %s1962_s25   ;;  %s1641_s24 = sphi %s1697_s24, %s1961_s24   ;;  %s1637_s23 = sphi %s1695_s23, %s1960_s23   ;;  %s1633_s22 = sphi %s1693_s22, %s1959_s22   ;;  %s1629_s21 = sphi %s1691_s21, %s1958_s21  }
   0x5   : > { %p26_p0 = scmp.ge.s32.totalorder %s25_s28, 2  ;;  %p44_p1 = scmp.ne.s32.totalorder %s1633_s22, %s1629_s21 }
   0x6   : > { %p45_p2 = scmp.eq.s32.totalorder %s1653_s27, 0  ;;  %s37_s9 = sadd.s32 1, %s1633_s22 }
   0x7   : > { %s1965_s28 = smov (%p26_p0, %s25_s28), 0  ;;  %s1967_s29 = smov (!%p26_p0, %s28_s29), %s1649_s26 }
   0x8   : > { %p46_p3 = por %p45_p2, %p44_p1  ;;  %p30_p4 = scmp.ge.s32.totalorder %s1967_s29, 2 }
   0x9   : > { %s33_s30 = ssub.s32 %s1645_s25, %s1965_s28  ;;  %p1295_p6 = scmp.ge.s32.totalorder %s1653_s27, 4 }
   0xa   : > { %s1969_s29 = smov (%p30_p4, %s1967_s29), 0 }
   0xb   : > { %s32_s7 = ssub.s32 %s1649_s26, %s1969_s29  ;;  %220 = sbr.rel (%p1295_p6) target bundleno = 32 (0x20), region = 28 }
   0xc   : > { %s34_s8 = sor.u32 %s33_s30, %s32_s7 }
   0xd   : > { %p35_p5 = scmp.eq.s32.totalorder %s34_s8, 0 }
   0xf   : > { %s1742_s10 = scalar_select %p35_p5, %s1633_s22, %s37_s9  }
  0x10   : > { %223 = sbr.rel (!%p46_p3) target bundleno = 32 (0x20), region = 32  ;;  %s225_s11 = sand.u32 (%p46_p3), 1, %s1633_s22  }
  0x11   : > { %s1373_s12 = sshll.u32 (%p46_p3), %s1649_s26, 5  ;;  %s1296_s13 = sshll.u32 (%p46_p3), %s225_s11, 6 }
  0x12   : > { %s230_s14 = sadd.s32 (%p46_p3), %s1645_s25, %s1373_s12  ;;  %s227_s19 = scalar_lea.vmem (%p46_p3), [#allocation3], %s1296_s13 }
  0x13   : > { %s1299_s15 = sshll.u32 (%p46_p3), %s230_s14, 2 }
  0x14   : > { %s1751_s18 = scalar_lea.vmem (%p46_p3), %s1951_s0, %s1299_s15 }
  0x15   : > { %v249_v0 = vld [vmem:[%s1751_s18] sm:$0xf]  ;;  %v251_v1 = vld [vmem:[%s1751_s18 + $0x8] sm:$0xf]  ;;  %v253_v2 = vld [vmem:[%s1751_s18 + $0x10] sm:$0xf] }
  0x16   : > { %250 = vst [vmem:[%s227_s19] sm:$0xf] %v249_v0  ;;  %252 = vst [vmem:[%s227_s19 + $0x4] sm:$0xf] %v251_v1  ;;  %v255_v3 = vld [vmem:[%s1751_s18 + $0x18] sm:$0xf] }
  0x17   : > { %254 = vst [vmem:[%s227_s19 + $0x8] sm:$0xf] %v253_v2  ;;  %v257_v4 = vld [vmem:[%s1751_s18 + $0x20] sm:$0xf]  ;;  %v259_v5 = vld [vmem:[%s1751_s18 + $0x28] sm:$0xf] }
  0x18   : > { %256 = vst [vmem:[%s227_s19 + $0xc] sm:$0xf] %v255_v3  ;;  %258 = vst [vmem:[%s227_s19 + $0x10] sm:$0xf] %v257_v4  ;;  %v261_v6 = vld [vmem:[%s1751_s18 + $0x30] sm:$0xf] }
  0x19   : > { %260 = vst [vmem:[%s227_s19 + $0x14] sm:$0xf] %v259_v5  ;;  %v263_v7 = vld [vmem:[%s1751_s18 + $0x38] sm:$0xf]  ;;  %v265_v8 = vld [vmem:[%s1751_s18 + $0x40] sm:$0xf] }
  0x1a   : > { %262 = vst [vmem:[%s227_s19 + $0x18] sm:$0xf] %v261_v6  ;;  %264 = vst [vmem:[%s227_s19 + $0x1c] sm:$0xf] %v263_v7  ;;  %v267_v9 = vld [vmem:[%s1751_s18 + $0x48] sm:$0xf] }
  0x1b   : > { %266 = vst [vmem:[%s227_s19 + $0x20] sm:$0xf] %v265_v8  ;;  %v269_v10 = vld [vmem:[%s1751_s18 + $0x50] sm:$0xf]  ;;  %v271_v11 = vld [vmem:[%s1751_s18 + $0x58] sm:$0xf] }
  0x1c   : > { %268 = vst [vmem:[%s227_s19 + $0x24] sm:$0xf] %v267_v9  ;;  %270 = vst [vmem:[%s227_s19 + $0x28] sm:$0xf] %v269_v10  ;;  %v273_v12 = vld [vmem:[%s1751_s18 + $0x60] sm:$0xf] }
  0x1d   : > { %272 = vst [vmem:[%s227_s19 + $0x2c] sm:$0xf] %v271_v11  ;;  %v275_v13 = vld [vmem:[%s1751_s18 + $0x68] sm:$0xf]  ;;  %v277_v14 = vld [vmem:[%s1751_s18 + $0x70] sm:$0xf] }
  0x1e   : > { %274 = vst [vmem:[%s227_s19 + $0x30] sm:$0xf] %v273_v12  ;;  %276 = vst [vmem:[%s227_s19 + $0x34] sm:$0xf] %v275_v13  ;;  %v279_v15 = vld [vmem:[%s1751_s18 + $0x78] sm:$0xf] }
  0x1f   : > { %278 = vst [vmem:[%s227_s19 + $0x38] sm:$0xf] %v277_v14  ;;  %280 = vst [vmem:[%s227_s19 + $0x3c] sm:$0xf] %v279_v15 }
  0x20 PF: > { %p1300_p7 = scmp.ge.s32.totalorder %s1653_s27, 1  ;;  %p353_p8 = scmp.lt.s32.totalorder %s1653_s27, 5 }
  0x22   : > { %p354_p9 = pnand %p1300_p7, %p353_p8 }
  0x23   : > { %s360_s20 = sand.u32 (!%p354_p9), 1, %s1629_s21   ;;  %s1302_s30 = sshll.u32 (!%p354_p9), %s1637_s23, 4 }
  0x24   : > { %357 = sbr.rel (%p354_p9) target bundleno = 543 (0x21f), region = 81  ;;  %s1301_s7 = sshll.u32 (!%p354_p9), %s360_s20, 6 }
  0x25   : > { %p401_p10 = scmp.lt.s32.totalorder (!%p354_p9), %s1302_s30, 31  ;;  %s1304_s8 = sshll.u32 (!%p354_p9), %s1641_s24, 4 }
  0x26   : > { %p407_p11 = scmp.lt.s32.totalorder (!%p354_p9), %s1304_s8, 31  ;;  %s1789_s24 = scalar_lea.vmem (!%p354_p9), [#allocation3], %s1301_s7 }
  0x27   : > { %p1308_p12 = scmp.ne.s32.totalorder (!%p354_p9), %s1637_s23, 0 }
  0x29   : > { %s1971_s30 = smov (!%p401_p10, %s1302_s30), 31  ;;  %s1973_s8 = smov (!%p407_p11, %s1304_s8), 31 }
  0x2a   : > { %s1303_s9 = sshll.u32 %s1971_s30, 2  ;;  %s1305_s14 = sshll.u32 %s1973_s8, 2 }
  0x2b   : > { %s1777_s13 = scalar_lea.vmem %s1952_s1, %s1303_s9  ;;  %s1782_s17 = scalar_lea.vmem %s1953_s2, %s1305_s14 }
  0x2c   : > { %s1787_s19 = scalar_lea.vmem %s1957_s6, %s1305_s14  ;;  %422 = sbr.rel (%p1308_p12) target bundleno = 58 (0x3a), region = 89 }
  0x31   : > { %vm423_vm0 = vcmask 261120   ;;  %v1655_v16 = vmov 0.0  }
  0x32   : > { %424 = vst.msk [vmem:[#allocation2] sm:$0xff] %vm423_vm0, %v1655_v16  ;;  %425 = vst.msk [vmem:[#allocation2 + $0x8] sm:$0xff] %vm423_vm0, %v1655_v16 }
  0x33   : > { %426 = vst.msk [vmem:[#allocation2 + $0x10] sm:$0xff] %vm423_vm0, %v1655_v16  ;;  %427 = vst.msk [vmem:[#allocation2 + $0x18] sm:$0xff] %vm423_vm0, %v1655_v16 }
  0x34   : > { %428 = vst.msk [vmem:[#allocation2 + $0x20] sm:$0xff] %vm423_vm0, %v1655_v16  ;;  %429 = vst.msk [vmem:[#allocation2 + $0x28] sm:$0xff] %vm423_vm0, %v1655_v16 }
  0x35   : > { %430 = vst.msk [vmem:[#allocation2 + $0x30] sm:$0xff] %vm423_vm0, %v1655_v16  ;;  %431 = vst.msk [vmem:[#allocation2 + $0x38] sm:$0xff] %vm423_vm0, %v1655_v16 }
  0x36   : > { %432 = vst.msk [vmem:[#allocation2 + $0x40] sm:$0xff] %vm423_vm0, %v1655_v16  ;;  %433 = vst.msk [vmem:[#allocation2 + $0x48] sm:$0xff] %vm423_vm0, %v1655_v16 }
  0x37   : > { %434 = vst.msk [vmem:[#allocation2 + $0x50] sm:$0xff] %vm423_vm0, %v1655_v16  ;;  %435 = vst.msk [vmem:[#allocation2 + $0x58] sm:$0xff] %vm423_vm0, %v1655_v16 }
  0x38   : > { %436 = vst.msk [vmem:[#allocation2 + $0x60] sm:$0xff] %vm423_vm0, %v1655_v16  ;;  %437 = vst.msk [vmem:[#allocation2 + $0x68] sm:$0xff] %vm423_vm0, %v1655_v16 }
  0x39   : > { %438 = vst.msk [vmem:[#allocation2 + $0x70] sm:$0xff] %vm423_vm0, %v1655_v16  ;;  %439 = vst.msk [vmem:[#allocation2 + $0x78] sm:$0xff] %vm423_vm0, %v1655_v16 }
  0x3a PF: > { %v1571_v17 = vld [vmem:[%s1777_s13 + $0x38] sm:$0xff]   ;;  %v1572_v18 = vld [vmem:[%s1777_s13 + $0x30] sm:$0xff]   ;;  %v1573_v19 = vld [vmem:[%s1777_s13 + $0x28] sm:$0xff]   ;;  %vm697_vm1 = vcmask 261120   ;;  %p1325_p13 = scmp.ne.s32.totalorder %s1637_s23, 1 }
  0x3b   : > { %1426 = vmatprep.subr.bf16.mxu0 %v1571_v17  ;;  %1498 = vmatprep.subr.bf16.mxu1 %v1571_v17  ;;  %v1574_v20 = vld [vmem:[%s1777_s13 + $0x20] sm:$0xff]   ;;  %v1575_v23 = vld [vmem:[%s1777_s13 + $0x18] sm:$0xff]   ;;  %v1576_v24 = vld [vmem:[%s1777_s13 + $0x10] sm:$0xff]  }
  0x3c   : > { %1427 = vmatpush3.bf16.msra.mxu0 %v1571_v17  ;;  %1506 = vmatpush3.bf16.msra.mxu1 %v1571_v17  ;;  %v1579_v21 = vld [vmem:[%s1789_s24] sm:$0xff]   ;;  %v1577_v25 = vld [vmem:[%s1777_s13 + $0x8] sm:$0xff]   ;;  %v1583_v29 = vld [vmem:[%s1789_s24 + $0x10] sm:$0xff]  }
  0x3d   : > { %1428 = vmatprep.subr.bf16.mxu0 %v1572_v18  ;;  %1499 = vmatprep.subr.bf16.mxu1 %v1572_v18  ;;  %v1580_v22 = vld [vmem:[%s1789_s24 + $0x20] sm:$0xff]   ;;  %v1581_v27 = vld [vmem:[%s1789_s24 + $0x8] sm:$0xff]   ;;  %v1584_v30 = vld [vmem:[%s1789_s24 + $0x30] sm:$0xff]  }
  0x3e   : > { %1442 = vmatprep.mubr.bf16.mxu0 %v1579_v21  ;;  %1450 = vmatprep.mubr.bf16.mxu1 %v1580_v22  ;;  %v1578_v26 = vld [vmem:[%s1777_s13] sm:$0xff]   ;;  %v1582_v28 = vld [vmem:[%s1789_s24 + $0x28] sm:$0xff]   ;;  %v1585_v31 = vld [vmem:[%s1789_s24 + $0x18] sm:$0xff]  }
  0x3f   : > { %v1586_v32 = vld [vmem:[%s1789_s24 + $0x38] sm:$0xff]   ;;  %v442_v33 = vld [vmem:[#allocation2 + $0x10] sm:$0xff]  ;;  %v440_v37 = vld [vmem:[#allocation2] sm:$0xff] }
  0x40   : > { %1429 = vmatpush3.bf16.msra.mxu0 %v1572_v18  ;;  %1507 = vmatpush3.bf16.msra.mxu1 %v1572_v18  ;;  %v450_v34 = vld [vmem:[#allocation2 + $0x50] sm:$0xff]  ;;  %v448_v38 = vld [vmem:[#allocation2 + $0x40] sm:$0xff]  ;;  %v443_v43 = vld [vmem:[#allocation2 + $0x18] sm:$0xff] }
  0x41   : > { %1430 = vmatprep.subr.bf16.mxu0 %v1573_v19  ;;  %1500 = vmatprep.subr.bf16.mxu1 %v1573_v19  ;;  %v451_v44 = vld [vmem:[#allocation2 + $0x58] sm:$0xff]  ;;  %v441_v49 = vld [vmem:[#allocation2 + $0x8] sm:$0xff]  ;;  %v446_v55 = vld [vmem:[#allocation2 + $0x30] sm:$0xff] }
  0x42   : > { %v449_v50 = vld [vmem:[#allocation2 + $0x48] sm:$0xff]  ;;  %v454_v56 = vld [vmem:[#allocation2 + $0x70] sm:$0xff]  ;;  %v444_v61 = vld [vmem:[#allocation2 + $0x20] sm:$0xff] }
  0x43   : > { %v452_v62 = vld [vmem:[#allocation2 + $0x60] sm:$0xff]  ;;  %v447_v3 = vld [vmem:[#allocation2 + $0x38] sm:$0xff]  ;;  %v445_v9 = vld [vmem:[#allocation2 + $0x28] sm:$0xff] }
  0x44   : > { %1431 = vmatpush3.bf16.msra.mxu0 %v1573_v19  ;;  %1508 = vmatpush3.bf16.msra.mxu1 %v1573_v19  ;;  %v455_v4 = vld [vmem:[#allocation2 + $0x78] sm:$0xff]  ;;  %v453_v10 = vld [vmem:[#allocation2 + $0x68] sm:$0xff] }
  0x45   : > { %1432 = vmatprep.subr.bf16.mxu0 %v1574_v20  ;;  %1501 = vmatprep.subr.bf16.mxu1 %v1574_v20 }
  0x48   : > { %1433 = vmatpush3.bf16.msra.mxu0 %v1574_v20  ;;  %1509 = vmatpush3.bf16.msra.mxu1 %v1574_v20 }
  0x49   : > { %1434 = vmatprep.subr.bf16.mxu0 %v1575_v23  ;;  %1502 = vmatprep.subr.bf16.mxu1 %v1575_v23 }
  0x4c   : > { %1435 = vmatpush3.bf16.msra.mxu0 %v1575_v23  ;;  %1510 = vmatpush3.bf16.msra.mxu1 %v1575_v23 }
  0x4d   : > { %1436 = vmatprep.subr.bf16.mxu0 %v1576_v24  ;;  %1503 = vmatprep.subr.bf16.mxu1 %v1576_v24 }
  0x50   : > { %1437 = vmatpush3.bf16.msra.mxu0 %v1576_v24  ;;  %1511 = vmatpush3.bf16.msra.mxu1 %v1576_v24 }
  0x51   : > { %1438 = vmatprep.subr.bf16.mxu0 %v1577_v25  ;;  %1504 = vmatprep.subr.bf16.mxu1 %v1577_v25 }
  0x54   : > { %1439 = vmatpush3.bf16.msra.mxu0 %v1577_v25  ;;  %1512 = vmatpush3.bf16.msra.mxu1 %v1577_v25 }
  0x55   : > { %1440 = vmatprep.subr.bf16.mxu0 %v1578_v26  ;;  %1505 = vmatprep.subr.bf16.mxu1 %v1578_v26 }
  0x58   : > { %1441 = vmatpush3.bf16.msra.mxu0 %v1578_v26  ;;  %1513 = vmatpush3.bf16.msra.mxu1 %v1578_v26 }
  0x5b   : > { %1443 = vmatmul.mubr.bf16.vlgmr.msra.gmra.mxu0 %v1581_v27  ;;  %1451 = vmatmul.mubr.bf16.vlgmr.msra.gmra.mxu1 %v1582_v28 }
  0x5c   : > { %1446 = vmatprep.mubr.bf16.mxu0 %v1583_v29  ;;  %1454 = vmatprep.mubr.bf16.mxu1 %v1584_v30 }
  0x63   : > { %1447 = vmatmul.mubr.bf16.gmra.mxu0 %v1585_v31  ;;  %1455 = vmatmul.mubr.bf16.gmra.mxu1 %v1586_v32 }
 0x11b   : > { %v1444_v35 = vpop.f32.mrf.mxu0  ;;  %v1452_v36 = vpop.f32.mrf.mxu1 }
 0x11c   : > { %v683_v39 = vadd.f32 %v1444_v35, %v442_v33  ;;  %v691_v40 = vadd.f32 %v1452_v36, %v450_v34 }
 0x11d   : > { %v618_v41 = vpop.f32.mrf.mxu0  ;;  %v650_v42 = vpop.f32.mrf.mxu1 }
 0x11e   : > { %700 = vst.msk [vmem:[#allocation2 + $0x10] sm:$0xff] %vm697_vm1, %v683_v39  ;;  %708 = vst.msk [vmem:[#allocation2 + $0x50] sm:$0xff] %vm697_vm1, %v691_v40  ;;  %v681_v45 = vadd.f32 %v618_v41, %v440_v37  ;;  %v689_v46 = vadd.f32 %v650_v42, %v448_v38 }
 0x11f   : > { %v1445_v47 = vpop.f32.mrf.mxu0  ;;  %v1453_v48 = vpop.f32.mrf.mxu1 }
 0x120   : > { %698 = vst.msk [vmem:[#allocation2] sm:$0xff] %vm697_vm1, %v681_v45  ;;  %706 = vst.msk [vmem:[#allocation2 + $0x40] sm:$0xff] %vm697_vm1, %v689_v46  ;;  %v684_v51 = vadd.f32 %v1445_v47, %v443_v43  ;;  %v692_v52 = vadd.f32 %v1453_v48, %v451_v44 }
 0x121   : > { %v621_v53 = vpop.f32.mrf.mxu0  ;;  %v653_v54 = vpop.f32.mrf.mxu1 }
 0x122   : > { %701 = vst.msk [vmem:[#allocation2 + $0x18] sm:$0xff] %vm697_vm1, %v684_v51  ;;  %709 = vst.msk [vmem:[#allocation2 + $0x58] sm:$0xff] %vm697_vm1, %v692_v52  ;;  %v682_v57 = vadd.f32 %v621_v53, %v441_v49  ;;  %v690_v58 = vadd.f32 %v653_v54, %v449_v50 }
 0x123   : > { %v1448_v59 = vpop.f32.mrf.mxu0  ;;  %v1456_v60 = vpop.f32.mrf.mxu1 }
 0x124   : > { %699 = vst.msk [vmem:[#allocation2 + $0x8] sm:$0xff] %vm697_vm1, %v682_v57  ;;  %707 = vst.msk [vmem:[#allocation2 + $0x48] sm:$0xff] %vm697_vm1, %v690_v58  ;;  %v687_v63 = vadd.f32 %v1448_v59, %v446_v55  ;;  %v695_v0 = vadd.f32 %v1456_v60, %v454_v56 }
 0x125   : > { %v634_v1 = vpop.f32.mrf.mxu0  ;;  %v666_v2 = vpop.f32.mrf.mxu1 }
 0x126   : > { %704 = vst.msk [vmem:[#allocation2 + $0x30] sm:$0xff] %vm697_vm1, %v687_v63  ;;  %712 = vst.msk [vmem:[#allocation2 + $0x70] sm:$0xff] %vm697_vm1, %v695_v0  ;;  %v685_v5 = vadd.f32 %v634_v1, %v444_v61  ;;  %v693_v6 = vadd.f32 %v666_v2, %v452_v62 }
 0x127   : > { %v1449_v7 = vpop.f32.mrf.mxu0  ;;  %v1457_v8 = vpop.f32.mrf.mxu1 }
 0x128   : > { %702 = vst.msk [vmem:[#allocation2 + $0x20] sm:$0xff] %vm697_vm1, %v685_v5  ;;  %710 = vst.msk [vmem:[#allocation2 + $0x60] sm:$0xff] %vm697_vm1, %v693_v6  ;;  %v688_v11 = vadd.f32 %v1449_v7, %v447_v3  ;;  %v696_v12 = vadd.f32 %v1457_v8, %v455_v4  ;;  %717 = sbr.rel (%p1325_p13) target bundleno = 543 (0x21f), region = 93 }
 0x129   : > { %v637_v13 = vpop.f32.mrf.mxu0  ;;  %v669_v14 = vpop.f32.mrf.mxu1 }
 0x12a   : > { %705 = vst.msk [vmem:[#allocation2 + $0x38] sm:$0xff] %vm697_vm1, %v688_v11  ;;  %713 = vst.msk [vmem:[#allocation2 + $0x78] sm:$0xff] %vm697_vm1, %v696_v12  ;;  %v686_v15 = vadd.f32 %v637_v13, %v445_v9  ;;  %v694_v16 = vadd.f32 %v669_v14, %v453_v10 }
 0x12c   : > { %703 = vst.msk [vmem:[#allocation2 + $0x28] sm:$0xff] %vm697_vm1, %v686_v15  ;;  %711 = vst.msk [vmem:[#allocation2 + $0x68] sm:$0xff] %vm697_vm1, %v694_v16 }
 0x12d   : > { %v1587_v17 = vld [vmem:[%s1955_s4 + $0x8] sm:$0xff]   ;;  %v1589_v19 = vld [vmem:[%s1955_s4] sm:$0xff]   ;;  %v720_v26 = vld [vmem:[#allocation2 + $0x10] sm:$0xff]  ;;  %vm1175_vm2 = vcmask 257024  }
 0x12e   : > { %v1588_v18 = vld [vmem:[%s1954_s3 + $0x8] sm:$0xff]   ;;  %1458 = vmatprep.subr.bf16.mxu0 %v1587_v17  ;;  %v1590_v20 = vld [vmem:[%s1954_s3] sm:$0xff]   ;;  %v721_v27 = vld [vmem:[#allocation2 + $0x18] sm:$0xff] }
 0x12f   : > { %1478 = vmatprep.subr.bf16.mxu1 %v1588_v18  ;;  %1459 = vmatpush3.bf16.msra.mxu0 %v1587_v17  ;;  %v1591_v21 = vld [vmem:[%s1782_s17] sm:$0xff]   ;;  %v719_v23 = vld [vmem:[#allocation2 + $0x8] sm:$0xff]  ;;  %v735_v28 = vpack.c.bf16 %v721_v27, %v720_v26  ;;  %v1593_v29 = vld [vmem:[%s1782_s17 + $0x10] sm:$0xff]  }
 0x130   : > { %1479 = vmatpush3.bf16.msra.mxu1 %v1588_v18  ;;  %1460 = vmatprep.subr.bf16.mxu0 %v1589_v19  ;;  %v718_v22 = vld [vmem:[#allocation2] sm:$0xff]  ;;  %v1592_v25 = vld [vmem:[%s1782_s17 + $0x8] sm:$0xff]   ;;  %v724_v33 = vld [vmem:[#allocation2 + $0x30] sm:$0xff] }
 0x131   : > { %1480 = vmatprep.subr.bf16.mxu1 %v1590_v20  ;;  %1462 = vmatprep.mubr.msk.bf16.mxu0 %vm697_vm1, %v1591_v21  ;;  %v734_v24 = vpack.c.bf16 %v719_v23, %v718_v22  ;;  %v722_v30 = vld [vmem:[#allocation2 + $0x20] sm:$0xff]  ;;  %v725_v34 = vld [vmem:[#allocation2 + $0x38] sm:$0xff]  ;;  %v727_v36 = vld [vmem:[#allocation2 + $0x48] sm:$0xff] }
 0x132   : > { %v726_v35 = vld [vmem:[#allocation2 + $0x40] sm:$0xff]  ;;  %v1594_v37 = vld [vmem:[%s1782_s17 + $0x18] sm:$0xff]   ;;  %v737_v38 = vpack.c.bf16 %v725_v34, %v724_v33  ;;  %v728_v41 = vld [vmem:[#allocation2 + $0x50] sm:$0xff] }
 0x133   : > { %1461 = vmatpush3.bf16.msra.mxu0 %v1589_v19  ;;  %1482 = vmatprep.mubr.msk.bf16.mxu1 %vm697_vm1, %v734_v24  ;;  %v723_v31 = vld [vmem:[#allocation2 + $0x28] sm:$0xff]  ;;  %v1595_v39 = vld [vmem:[%s1782_s17 + $0x20] sm:$0xff]   ;;  %v738_v40 = vpack.c.bf16 %v727_v36, %v726_v35  ;;  %v729_v42 = vld [vmem:[#allocation2 + $0x58] sm:$0xff] }
 0x134   : > { %1481 = vmatpush3.bf16.msra.mxu1 %v1590_v20  ;;  %v736_v32 = vpack.c.bf16 %v723_v31, %v722_v30  ;;  %v730_v43 = vld [vmem:[#allocation2 + $0x60] sm:$0xff]  ;;  %v731_v44 = vld [vmem:[#allocation2 + $0x68] sm:$0xff]  ;;  %v739_v46 = vpack.c.bf16 %v729_v42, %v728_v41  ;;  %v1597_v47 = vld [vmem:[%s1782_s17 + $0x30] sm:$0xff]  }
 0x135   : > { %v1596_v45 = vld [vmem:[%s1782_s17 + $0x28] sm:$0xff]   ;;  %v740_v48 = vpack.c.bf16 %v731_v44, %v730_v43  ;;  %v732_v49 = vld [vmem:[#allocation2 + $0x70] sm:$0xff]  ;;  %v733_v50 = vld [vmem:[#allocation2 + $0x78] sm:$0xff] }
 0x136   : > { %1463 = vmatmul.mubr.msk.bf16.vlgmr.msra.gmra.mxu0 %vm697_vm1, %v1592_v25  ;;  %v1598_v51 = vld [vmem:[%s1782_s17 + $0x38] sm:$0xff]   ;;  %v741_v52 = vpack.c.bf16 %v733_v50, %v732_v49  ;;  %v1880_v55 = vld [vmem:[%s1956_s5] ss:$0 sm:$0xff] }
 0x137   : > { %1483 = vmatmul.mubr.msk.bf16.vlgmr.msra.gmra.mxu1 %vm697_vm1, %v735_v28  ;;  %1466 = vmatprep.mubr.msk.bf16.mxu0 %vm697_vm1, %v1593_v29 }
 0x138   : > { %1486 = vmatprep.mubr.msk.bf16.mxu1 %vm697_vm1, %v736_v32 }
 0x13e   : > { %1467 = vmatmul.mubr.msk.bf16.gmra.mxu0 %vm697_vm1, %v1594_v37 }
 0x13f   : > { %1487 = vmatmul.mubr.msk.bf16.gmra.mxu1 %vm697_vm1, %v737_v38  ;;  %1470 = vmatprep.mubr.msk.bf16.mxu0 %vm697_vm1, %v1595_v39 }
 0x140   : > { %1490 = vmatprep.mubr.msk.bf16.mxu1 %vm697_vm1, %v738_v40 }
 0x146   : > { %1471 = vmatmul.mubr.msk.bf16.gmra.mxu0 %vm697_vm1, %v1596_v45 }
 0x147   : > { %1491 = vmatmul.mubr.msk.bf16.gmra.mxu1 %vm697_vm1, %v739_v46  ;;  %1474 = vmatprep.mubr.msk.bf16.mxu0 %vm697_vm1, %v1597_v47 }
 0x148   : > { %1494 = vmatprep.mubr.msk.bf16.mxu1 %vm697_vm1, %v740_v48 }
 0x14e   : > { %1475 = vmatmul.mubr.msk.bf16.gmra.mxu0 %vm697_vm1, %v1598_v51 }
 0x14f   : > { %1495 = vmatmul.mubr.msk.bf16.gmra.mxu1 %vm697_vm1, %v741_v52 }
 0x1f6   : > { %v1464_v53 = vpop.f32.mrf.mxu0 }
 0x1f7   : > { %v1484_v54 = vpop.f32.mrf.mxu1 }
 0x1f8   : > { %v1018_v56 = vadd.f32 %v1484_v54, %v1464_v53  ;;  %v876_v57 = vpop.f32.mrf.mxu0 }
 0x1f9   : > { %v1009_v58 = vpop.f32.mrf.mxu1 }
 0x1fa   : > { %v1081_v59 = vadd.f32 %v1880_v55, %v1018_v56  ;;  %v1010_v60 = vadd.f32 %v1009_v58, %v876_v57  ;;  %v1465_v61 = vpop.f32.mrf.mxu0 }
 0x1fb   : > { %v1485_v62 = vpop.f32.mrf.mxu1 }
 0x1fc   : > { %v1097_v63 = vmax.f32 %v1081_v59, 0.0  ;;  %v1079_v0 = vadd.f32 %v1880_v55, %v1010_v60  ;;  %v1021_v1 = vadd.f32 %v1485_v62, %v1465_v61  ;;  %v879_v2 = vpop.f32.mrf.mxu0 }
 0x1fd   : > { %v1012_v3 = vpop.f32.mrf.mxu1 }
 0x1fe   : > { %v1376_v4 = vpack.c.bf16 %v1097_v63, %v1097_v63  ;;  %v1095_v5 = vmax.f32 %v1079_v0, 0.0  ;;  %v1082_v6 = vadd.f32 %v1880_v55, %v1021_v1  ;;  %v1013_v7 = vadd.f32 %v1012_v3, %v879_v2  ;;  %v1468_v8 = vpop.f32.mrf.mxu0 }
 0x1ff   : > { %v1488_v9 = vpop.f32.mrf.mxu1 }
 0x200   : > { %1178 = vst.msk [vmem:[%s1787_s19 + $0x8] sm:$0xf] %vm1175_vm2, %v1376_v4  ;;  %v1374_v10 = vpack.c.bf16 %v1095_v5, %v1095_v5  ;;  %v1098_v11 = vmax.f32 %v1082_v6, 0.0  ;;  %v1080_v12 = vadd.f32 %v1880_v55, %v1013_v7  ;;  %v1034_v13 = vadd.f32 %v1488_v9, %v1468_v8  ;;  %v892_v14 = vpop.f32.mrf.mxu0 }
 0x201   : > { %v1025_v15 = vpop.f32.mrf.mxu1 }
 0x202   : > { %1176 = vst.msk [vmem:[%s1787_s19] sm:$0xf] %vm1175_vm2, %v1374_v10  ;;  %v1377_v16 = vpack.c.bf16 %v1098_v11, %v1098_v11  ;;  %v1096_v17 = vmax.f32 %v1080_v12, 0.0  ;;  %v1085_v18 = vadd.f32 %v1880_v55, %v1034_v13  ;;  %v1026_v19 = vadd.f32 %v1025_v15, %v892_v14  ;;  %v1469_v20 = vpop.f32.mrf.mxu0 }
 0x203   : > { %v1489_v21 = vpop.f32.mrf.mxu1 }
 0x204   : > { %1179 = vst.msk [vmem:[%s1787_s19 + $0xc] sm:$0xf] %vm1175_vm2, %v1377_v16  ;;  %v1375_v22 = vpack.c.bf16 %v1096_v17, %v1096_v17  ;;  %v1101_v23 = vmax.f32 %v1085_v18, 0.0  ;;  %v1083_v24 = vadd.f32 %v1880_v55, %v1026_v19  ;;  %v1037_v25 = vadd.f32 %v1489_v21, %v1469_v20  ;;  %v895_v26 = vpop.f32.mrf.mxu0 }
 0x205   : > { %v1028_v27 = vpop.f32.mrf.mxu1 }
 0x206   : > { %1177 = vst.msk [vmem:[%s1787_s19 + $0x4] sm:$0xf] %vm1175_vm2, %v1375_v22  ;;  %v1380_v28 = vpack.c.bf16 %v1101_v23, %v1101_v23  ;;  %v1099_v29 = vmax.f32 %v1083_v24, 0.0  ;;  %v1086_v30 = vadd.f32 %v1880_v55, %v1037_v25  ;;  %v1029_v31 = vadd.f32 %v1028_v27, %v895_v26  ;;  %v1472_v32 = vpop.f32.mrf.mxu0 }
 0x207   : > { %v1492_v33 = vpop.f32.mrf.mxu1 }
 0x208   : > { %1182 = vst.msk [vmem:[%s1787_s19 + $0x18] sm:$0xf] %vm1175_vm2, %v1380_v28  ;;  %v1378_v34 = vpack.c.bf16 %v1099_v29, %v1099_v29  ;;  %v1102_v35 = vmax.f32 %v1086_v30, 0.0  ;;  %v1084_v36 = vadd.f32 %v1880_v55, %v1029_v31  ;;  %v1050_v37 = vadd.f32 %v1492_v33, %v1472_v32  ;;  %v908_v38 = vpop.f32.mrf.mxu0 }
 0x209   : > { %v1041_v39 = vpop.f32.mrf.mxu1 }
 0x20a   : > { %1180 = vst.msk [vmem:[%s1787_s19 + $0x10] sm:$0xf] %vm1175_vm2, %v1378_v34  ;;  %v1381_v40 = vpack.c.bf16 %v1102_v35, %v1102_v35  ;;  %v1100_v41 = vmax.f32 %v1084_v36, 0.0  ;;  %v1089_v42 = vadd.f32 %v1880_v55, %v1050_v37  ;;  %v1042_v43 = vadd.f32 %v1041_v39, %v908_v38  ;;  %v1473_v44 = vpop.f32.mrf.mxu0 }
 0x20b   : > { %v1493_v45 = vpop.f32.mrf.mxu1 }
 0x20c   : > { %1183 = vst.msk [vmem:[%s1787_s19 + $0x1c] sm:$0xf] %vm1175_vm2, %v1381_v40  ;;  %v1379_v46 = vpack.c.bf16 %v1100_v41, %v1100_v41  ;;  %v1105_v47 = vmax.f32 %v1089_v42, 0.0  ;;  %v1087_v48 = vadd.f32 %v1880_v55, %v1042_v43  ;;  %v1053_v49 = vadd.f32 %v1493_v45, %v1473_v44  ;;  %v911_v50 = vpop.f32.mrf.mxu0 }
 0x20d   : > { %v1044_v51 = vpop.f32.mrf.mxu1 }
 0x20e   : > { %1181 = vst.msk [vmem:[%s1787_s19 + $0x14] sm:$0xf] %vm1175_vm2, %v1379_v46  ;;  %v1384_v52 = vpack.c.bf16 %v1105_v47, %v1105_v47  ;;  %v1103_v53 = vmax.f32 %v1087_v48, 0.0  ;;  %v1090_v54 = vadd.f32 %v1880_v55, %v1053_v49  ;;  %v1045_v56 = vadd.f32 %v1044_v51, %v911_v50  ;;  %v1476_v57 = vpop.f32.mrf.mxu0 }
 0x20f   : > { %v1496_v58 = vpop.f32.mrf.mxu1 }
 0x210   : > { %1186 = vst.msk [vmem:[%s1787_s19 + $0x28] sm:$0xf] %vm1175_vm2, %v1384_v52  ;;  %v1382_v59 = vpack.c.bf16 %v1103_v53, %v1103_v53  ;;  %v1106_v60 = vmax.f32 %v1090_v54, 0.0  ;;  %v1088_v61 = vadd.f32 %v1880_v55, %v1045_v56  ;;  %v1066_v62 = vadd.f32 %v1496_v58, %v1476_v57  ;;  %v924_v63 = vpop.f32.mrf.mxu0 }
 0x211   : > { %v1057_v0 = vpop.f32.mrf.mxu1 }
 0x212   : > { %1184 = vst.msk [vmem:[%s1787_s19 + $0x20] sm:$0xf] %vm1175_vm2, %v1382_v59  ;;  %v1385_v1 = vpack.c.bf16 %v1106_v60, %v1106_v60  ;;  %v1104_v2 = vmax.f32 %v1088_v61, 0.0  ;;  %v1093_v3 = vadd.f32 %v1880_v55, %v1066_v62  ;;  %v1058_v4 = vadd.f32 %v1057_v0, %v924_v63  ;;  %v1477_v5 = vpop.f32.mrf.mxu0 }
 0x213   : > { %v1497_v6 = vpop.f32.mrf.mxu1 }
 0x214   : > { %1187 = vst.msk [vmem:[%s1787_s19 + $0x2c] sm:$0xf] %vm1175_vm2, %v1385_v1  ;;  %v1383_v7 = vpack.c.bf16 %v1104_v2, %v1104_v2  ;;  %v1109_v8 = vmax.f32 %v1093_v3, 0.0  ;;  %v1091_v9 = vadd.f32 %v1880_v55, %v1058_v4  ;;  %v1069_v10 = vadd.f32 %v1497_v6, %v1477_v5  ;;  %v927_v11 = vpop.f32.mrf.mxu0 }
 0x215   : > { %v1060_v12 = vpop.f32.mrf.mxu1 }
 0x216   : > { %1185 = vst.msk [vmem:[%s1787_s19 + $0x24] sm:$0xf] %vm1175_vm2, %v1383_v7  ;;  %v1388_v13 = vpack.c.bf16 %v1109_v8, %v1109_v8  ;;  %v1107_v14 = vmax.f32 %v1091_v9, 0.0  ;;  %v1094_v15 = vadd.f32 %v1880_v55, %v1069_v10  ;;  %v1061_v16 = vadd.f32 %v1060_v12, %v927_v11 }
 0x218   : > { %1190 = vst.msk [vmem:[%s1787_s19 + $0x38] sm:$0xf] %vm1175_vm2, %v1388_v13  ;;  %v1386_v17 = vpack.c.bf16 %v1107_v14, %v1107_v14  ;;  %v1110_v18 = vmax.f32 %v1094_v15, 0.0  ;;  %v1092_v19 = vadd.f32 %v1880_v55, %v1061_v16 }
 0x21a   : > { %1188 = vst.msk [vmem:[%s1787_s19 + $0x30] sm:$0xf] %vm1175_vm2, %v1386_v17  ;;  %v1389_v20 = vpack.c.bf16 %v1110_v18, %v1110_v18  ;;  %v1108_v21 = vmax.f32 %v1092_v19, 0.0 }
 0x21c   : > { %1191 = vst.msk [vmem:[%s1787_s19 + $0x3c] sm:$0xf] %vm1175_vm2, %v1389_v20  ;;  %v1387_v22 = vpack.c.bf16 %v1108_v21, %v1108_v21 }
 0x21e   : > { %1189 = vst.msk [vmem:[%s1787_s19 + $0x34] sm:$0xf] %vm1175_vm2, %v1387_v22 }
 0x21f PF: > { %s16_s27 = sadd.s32 1, %s1653_s27   ;;  %s1958_s21 = smov %s1633_s22 }
 0x220   : > { %p13_p0 = scmp.ge.s32.totalorder %s16_s27, 6   ;;  %s1959_s22 = smov %s1742_s10 }
 0x221   : > { %s1960_s23 = smov %s1645_s25  ;;  %s1961_s24 = smov %s1649_s26 }
 0x222   : > { %s1962_s25 = smov %s1965_s28  ;;  %s1963_s26 = smov %s1969_s29 }
 0x223   :  { %15 = sbr.rel (!%p13_p0) target bundleno = 4 (0x4), region = 134 }

// kernel: model_forward.8
= control target key start
LH: loop header
LB: loop body
LE: loop exit
PB: predicated region body
PF: predicated region fallthrough
CT: control target
= control target key end

     0   :  { %s1675_s21 = smov 0   ;;  %s1677_s22 = smov 0   ;;  %s1935_s0 = inlined_call_operand.vmem [shape: bf16[256,256], index: 0, kind: input, shape index: {}]   ;;  %s1936_s1 = inlined_call_operand.vmem [shape: bf16[256,32], index: 1, kind: input, shape index: {}]   ;;  %s1937_s2 = inlined_call_operand.vmem [shape: bf16[256,32], index: 2, kind: input, shape index: {}]   ;;  %s1938_s3 = inlined_call_operand.vmem [shape: bf16[32,32], index: 3, kind: input, shape index: {}]   ;;  %s1939_s4 = inlined_call_operand.vmem [shape: bf16[32,32], index: 4, kind: input, shape index: {}]   ;;  %s1940_s5 = inlined_call_operand.vmem [shape: f32[1,32], index: 5, kind: input, shape index: {}]   ;;  %s1941_s6 = inlined_call_operand.vmem [shape: bf16[256,32], index: 6, kind: output, shape index: {}]  }
   0x1   :  { %s1679_s23 = smov 0   ;;  %s1681_s24 = smov 0  }
   0x2   :  { %s1683_s25 = smov 0   ;;  %s1685_s26 = smov 0  }
   0x3   :  { %s1687_s27 = smov 0  }
   0x4 LB: > { %s25_s28 = sadd.s32 1, %s1629_s25  ;;  %s28_s29 = sadd.s32 1, %s1633_s26  ;;  %s1637_s27 = sphi %s1687_s27, %s16_s27   ;;  %s1633_s26 = sphi %s1685_s26, %s1947_s26   ;;  %s1629_s25 = sphi %s1683_s25, %s1946_s25   ;;  %s1625_s24 = sphi %s1681_s24, %s1945_s24   ;;  %s1621_s23 = sphi %s1679_s23, %s1944_s23   ;;  %s1617_s22 = sphi %s1677_s22, %s1943_s22   ;;  %s1613_s21 = sphi %s1675_s21, %s1942_s21  }
   0x5   : > { %p26_p0 = scmp.ge.s32.totalorder %s25_s28, 2  ;;  %p44_p1 = scmp.ne.s32.totalorder %s1617_s22, %s1613_s21 }
   0x6   : > { %p45_p2 = scmp.eq.s32.totalorder %s1637_s27, 0  ;;  %s37_s9 = sadd.s32 1, %s1617_s22 }
   0x7   : > { %s1949_s28 = smov (%p26_p0, %s25_s28), 0  ;;  %s1951_s29 = smov (!%p26_p0, %s28_s29), %s1633_s26 }
   0x8   : > { %p46_p3 = por %p45_p2, %p44_p1  ;;  %p30_p4 = scmp.ge.s32.totalorder %s1951_s29, 2 }
   0x9   : > { %s33_s30 = ssub.s32 %s1629_s25, %s1949_s28  ;;  %p1279_p6 = scmp.ge.s32.totalorder %s1637_s27, 4 }
   0xa   : > { %s1953_s29 = smov (%p30_p4, %s1951_s29), 0 }
   0xb   : > { %s32_s7 = ssub.s32 %s1633_s26, %s1953_s29  ;;  %220 = sbr.rel (%p1279_p6) target bundleno = 32 (0x20), region = 28 }
   0xc   : > { %s34_s8 = sor.u32 %s33_s30, %s32_s7 }
   0xd   : > { %p35_p5 = scmp.eq.s32.totalorder %s34_s8, 0 }
   0xf   : > { %s1726_s10 = scalar_select %p35_p5, %s1617_s22, %s37_s9  }
  0x10   : > { %223 = sbr.rel (!%p46_p3) target bundleno = 32 (0x20), region = 32  ;;  %s225_s11 = sand.u32 (%p46_p3), 1, %s1617_s22  }
  0x11   : > { %s1357_s12 = sshll.u32 (%p46_p3), %s1633_s26, 5  ;;  %s1280_s13 = sshll.u32 (%p46_p3), %s225_s11, 6 }
  0x12   : > { %s230_s14 = sadd.s32 (%p46_p3), %s1629_s25, %s1357_s12  ;;  %s227_s19 = scalar_lea.vmem (%p46_p3), [#allocation3], %s1280_s13 }
  0x13   : > { %s1283_s15 = sshll.u32 (%p46_p3), %s230_s14, 2 }
  0x14   : > { %s1735_s18 = scalar_lea.vmem (%p46_p3), %s1935_s0, %s1283_s15 }
  0x15   : > { %v249_v0 = vld [vmem:[%s1735_s18] sm:$0xf]  ;;  %v251_v1 = vld [vmem:[%s1735_s18 + $0x8] sm:$0xf]  ;;  %v253_v2 = vld [vmem:[%s1735_s18 + $0x10] sm:$0xf] }
  0x16   : > { %250 = vst [vmem:[%s227_s19] sm:$0xf] %v249_v0  ;;  %252 = vst [vmem:[%s227_s19 + $0x4] sm:$0xf] %v251_v1  ;;  %v255_v3 = vld [vmem:[%s1735_s18 + $0x18] sm:$0xf] }
  0x17   : > { %254 = vst [vmem:[%s227_s19 + $0x8] sm:$0xf] %v253_v2  ;;  %v257_v4 = vld [vmem:[%s1735_s18 + $0x20] sm:$0xf]  ;;  %v259_v5 = vld [vmem:[%s1735_s18 + $0x28] sm:$0xf] }
  0x18   : > { %256 = vst [vmem:[%s227_s19 + $0xc] sm:$0xf] %v255_v3  ;;  %258 = vst [vmem:[%s227_s19 + $0x10] sm:$0xf] %v257_v4  ;;  %v261_v6 = vld [vmem:[%s1735_s18 + $0x30] sm:$0xf] }
  0x19   : > { %260 = vst [vmem:[%s227_s19 + $0x14] sm:$0xf] %v259_v5  ;;  %v263_v7 = vld [vmem:[%s1735_s18 + $0x38] sm:$0xf]  ;;  %v265_v8 = vld [vmem:[%s1735_s18 + $0x40] sm:$0xf] }
  0x1a   : > { %262 = vst [vmem:[%s227_s19 + $0x18] sm:$0xf] %v261_v6  ;;  %264 = vst [vmem:[%s227_s19 + $0x1c] sm:$0xf] %v263_v7  ;;  %v267_v9 = vld [vmem:[%s1735_s18 + $0x48] sm:$0xf] }
  0x1b   : > { %266 = vst [vmem:[%s227_s19 + $0x20] sm:$0xf] %v265_v8  ;;  %v269_v10 = vld [vmem:[%s1735_s18 + $0x50] sm:$0xf]  ;;  %v271_v11 = vld [vmem:[%s1735_s18 + $0x58] sm:$0xf] }
  0x1c   : > { %268 = vst [vmem:[%s227_s19 + $0x24] sm:$0xf] %v267_v9  ;;  %270 = vst [vmem:[%s227_s19 + $0x28] sm:$0xf] %v269_v10  ;;  %v273_v12 = vld [vmem:[%s1735_s18 + $0x60] sm:$0xf] }
  0x1d   : > { %272 = vst [vmem:[%s227_s19 + $0x2c] sm:$0xf] %v271_v11  ;;  %v275_v13 = vld [vmem:[%s1735_s18 + $0x68] sm:$0xf]  ;;  %v277_v14 = vld [vmem:[%s1735_s18 + $0x70] sm:$0xf] }
  0x1e   : > { %274 = vst [vmem:[%s227_s19 + $0x30] sm:$0xf] %v273_v12  ;;  %276 = vst [vmem:[%s227_s19 + $0x34] sm:$0xf] %v275_v13  ;;  %v279_v15 = vld [vmem:[%s1735_s18 + $0x78] sm:$0xf] }
  0x1f   : > { %278 = vst [vmem:[%s227_s19 + $0x38] sm:$0xf] %v277_v14  ;;  %280 = vst [vmem:[%s227_s19 + $0x3c] sm:$0xf] %v279_v15 }
  0x20 PF: > { %p1284_p7 = scmp.ge.s32.totalorder %s1637_s27, 1  ;;  %p353_p8 = scmp.lt.s32.totalorder %s1637_s27, 5 }
  0x22   : > { %p354_p9 = pnand %p1284_p7, %p353_p8 }
  0x23   : > { %s360_s20 = sand.u32 (!%p354_p9), 1, %s1613_s21   ;;  %s1286_s30 = sshll.u32 (!%p354_p9), %s1621_s23, 4 }
  0x24   : > { %357 = sbr.rel (%p354_p9) target bundleno = 541 (0x21d), region = 81  ;;  %s1285_s7 = sshll.u32 (!%p354_p9), %s360_s20, 6 }
  0x25   : > { %p401_p10 = scmp.lt.s32.totalorder (!%p354_p9), %s1286_s30, 31  ;;  %s1288_s8 = sshll.u32 (!%p354_p9), %s1625_s24, 4 }
  0x26   : > { %p407_p11 = scmp.lt.s32.totalorder (!%p354_p9), %s1288_s8, 31  ;;  %s1773_s24 = scalar_lea.vmem (!%p354_p9), [#allocation3], %s1285_s7 }
  0x27   : > { %p1292_p12 = scmp.ne.s32.totalorder (!%p354_p9), %s1621_s23, 0 }
  0x29   : > { %s1955_s30 = smov (!%p401_p10, %s1286_s30), 31  ;;  %s1957_s8 = smov (!%p407_p11, %s1288_s8), 31 }
  0x2a   : > { %s1287_s9 = sshll.u32 %s1955_s30, 2  ;;  %s1289_s14 = sshll.u32 %s1957_s8, 2 }
  0x2b   : > { %s1761_s13 = scalar_lea.vmem %s1936_s1, %s1287_s9  ;;  %s1766_s17 = scalar_lea.vmem %s1937_s2, %s1289_s14 }
  0x2c   : > { %s1771_s19 = scalar_lea.vmem %s1941_s6, %s1289_s14  ;;  %422 = sbr.rel (%p1292_p12) target bundleno = 58 (0x3a), region = 89 }
  0x31   : > { %vm423_vm0 = vcmask 261120   ;;  %v1639_v16 = vmov 0.0  }
  0x32   : > { %424 = vst.msk [vmem:[#allocation2] sm:$0xff] %vm423_vm0, %v1639_v16  ;;  %425 = vst.msk [vmem:[#allocation2 + $0x8] sm:$0xff] %vm423_vm0, %v1639_v16 }
  0x33   : > { %426 = vst.msk [vmem:[#allocation2 + $0x10] sm:$0xff] %vm423_vm0, %v1639_v16  ;;  %427 = vst.msk [vmem:[#allocation2 + $0x18] sm:$0xff] %vm423_vm0, %v1639_v16 }
  0x34   : > { %428 = vst.msk [vmem:[#allocation2 + $0x20] sm:$0xff] %vm423_vm0, %v1639_v16  ;;  %429 = vst.msk [vmem:[#allocation2 + $0x28] sm:$0xff] %vm423_vm0, %v1639_v16 }
  0x35   : > { %430 = vst.msk [vmem:[#allocation2 + $0x30] sm:$0xff] %vm423_vm0, %v1639_v16  ;;  %431 = vst.msk [vmem:[#allocation2 + $0x38] sm:$0xff] %vm423_vm0, %v1639_v16 }
  0x36   : > { %432 = vst.msk [vmem:[#allocation2 + $0x40] sm:$0xff] %vm423_vm0, %v1639_v16  ;;  %433 = vst.msk [vmem:[#allocation2 + $0x48] sm:$0xff] %vm423_vm0, %v1639_v16 }
  0x37   : > { %434 = vst.msk [vmem:[#allocation2 + $0x50] sm:$0xff] %vm423_vm0, %v1639_v16  ;;  %435 = vst.msk [vmem:[#allocation2 + $0x58] sm:$0xff] %vm423_vm0, %v1639_v16 }
  0x38   : > { %436 = vst.msk [vmem:[#allocation2 + $0x60] sm:$0xff] %vm423_vm0, %v1639_v16  ;;  %437 = vst.msk [vmem:[#allocation2 + $0x68] sm:$0xff] %vm423_vm0, %v1639_v16 }
  0x39   : > { %438 = vst.msk [vmem:[#allocation2 + $0x70] sm:$0xff] %vm423_vm0, %v1639_v16  ;;  %439 = vst.msk [vmem:[#allocation2 + $0x78] sm:$0xff] %vm423_vm0, %v1639_v16 }
  0x3a PF: > { %v1555_v17 = vld [vmem:[%s1761_s13 + $0x38] sm:$0xff]   ;;  %v1556_v18 = vld [vmem:[%s1761_s13 + $0x30] sm:$0xff]   ;;  %v1557_v19 = vld [vmem:[%s1761_s13 + $0x28] sm:$0xff]   ;;  %vm697_vm1 = vcmask 261120   ;;  %p1309_p13 = scmp.ne.s32.totalorder %s1621_s23, 1 }
  0x3b   : > { %1410 = vmatprep.subr.bf16.mxu0 %v1555_v17  ;;  %1482 = vmatprep.subr.bf16.mxu1 %v1555_v17  ;;  %v1558_v20 = vld [vmem:[%s1761_s13 + $0x20] sm:$0xff]   ;;  %v1559_v23 = vld [vmem:[%s1761_s13 + $0x18] sm:$0xff]   ;;  %v1560_v24 = vld [vmem:[%s1761_s13 + $0x10] sm:$0xff]  }
  0x3c   : > { %1411 = vmatpush3.bf16.msra.mxu0 %v1555_v17  ;;  %1490 = vmatpush3.bf16.msra.mxu1 %v1555_v17  ;;  %v1563_v21 = vld [vmem:[%s1773_s24] sm:$0xff]   ;;  %v1561_v25 = vld [vmem:[%s1761_s13 + $0x8] sm:$0xff]   ;;  %v1567_v29 = vld [vmem:[%s1773_s24 + $0x10] sm:$0xff]  }
  0x3d   : > { %1412 = vmatprep.subr.bf16.mxu0 %v1556_v18  ;;  %1483 = vmatprep.subr.bf16.mxu1 %v1556_v18  ;;  %v1564_v22 = vld [vmem:[%s1773_s24 + $0x20] sm:$0xff]   ;;  %v1565_v27 = vld [vmem:[%s1773_s24 + $0x8] sm:$0xff]   ;;  %v1568_v30 = vld [vmem:[%s1773_s24 + $0x30] sm:$0xff]  }
  0x3e   : > { %1426 = vmatprep.mubr.bf16.mxu0 %v1563_v21  ;;  %1434 = vmatprep.mubr.bf16.mxu1 %v1564_v22  ;;  %v1562_v26 = vld [vmem:[%s1761_s13] sm:$0xff]   ;;  %v1566_v28 = vld [vmem:[%s1773_s24 + $0x28] sm:$0xff]   ;;  %v1569_v31 = vld [vmem:[%s1773_s24 + $0x18] sm:$0xff]  }
  0x3f   : > { %v1570_v32 = vld [vmem:[%s1773_s24 + $0x38] sm:$0xff]   ;;  %v442_v33 = vld [vmem:[#allocation2 + $0x10] sm:$0xff]  ;;  %v440_v37 = vld [vmem:[#allocation2] sm:$0xff] }
  0x40   : > { %1413 = vmatpush3.bf16.msra.mxu0 %v1556_v18  ;;  %1491 = vmatpush3.bf16.msra.mxu1 %v1556_v18  ;;  %v450_v34 = vld [vmem:[#allocation2 + $0x50] sm:$0xff]  ;;  %v448_v38 = vld [vmem:[#allocation2 + $0x40] sm:$0xff]  ;;  %v443_v43 = vld [vmem:[#allocation2 + $0x18] sm:$0xff] }
  0x41   : > { %1414 = vmatprep.subr.bf16.mxu0 %v1557_v19  ;;  %1484 = vmatprep.subr.bf16.mxu1 %v1557_v19  ;;  %v451_v44 = vld [vmem:[#allocation2 + $0x58] sm:$0xff]  ;;  %v441_v49 = vld [vmem:[#allocation2 + $0x8] sm:$0xff]  ;;  %v446_v55 = vld [vmem:[#allocation2 + $0x30] sm:$0xff] }
  0x42   : > { %v449_v50 = vld [vmem:[#allocation2 + $0x48] sm:$0xff]  ;;  %v454_v56 = vld [vmem:[#allocation2 + $0x70] sm:$0xff]  ;;  %v444_v61 = vld [vmem:[#allocation2 + $0x20] sm:$0xff] }
  0x43   : > { %v452_v62 = vld [vmem:[#allocation2 + $0x60] sm:$0xff]  ;;  %v447_v3 = vld [vmem:[#allocation2 + $0x38] sm:$0xff]  ;;  %v445_v9 = vld [vmem:[#allocation2 + $0x28] sm:$0xff] }
  0x44   : > { %1415 = vmatpush3.bf16.msra.mxu0 %v1557_v19  ;;  %1492 = vmatpush3.bf16.msra.mxu1 %v1557_v19  ;;  %v455_v4 = vld [vmem:[#allocation2 + $0x78] sm:$0xff]  ;;  %v453_v10 = vld [vmem:[#allocation2 + $0x68] sm:$0xff] }
  0x45   : > { %1416 = vmatprep.subr.bf16.mxu0 %v1558_v20  ;;  %1485 = vmatprep.subr.bf16.mxu1 %v1558_v20 }
  0x48   : > { %1417 = vmatpush3.bf16.msra.mxu0 %v1558_v20  ;;  %1493 = vmatpush3.bf16.msra.mxu1 %v1558_v20 }
  0x49   : > { %1418 = vmatprep.subr.bf16.mxu0 %v1559_v23  ;;  %1486 = vmatprep.subr.bf16.mxu1 %v1559_v23 }
  0x4c   : > { %1419 = vmatpush3.bf16.msra.mxu0 %v1559_v23  ;;  %1494 = vmatpush3.bf16.msra.mxu1 %v1559_v23 }
  0x4d   : > { %1420 = vmatprep.subr.bf16.mxu0 %v1560_v24  ;;  %1487 = vmatprep.subr.bf16.mxu1 %v1560_v24 }
  0x50   : > { %1421 = vmatpush3.bf16.msra.mxu0 %v1560_v24  ;;  %1495 = vmatpush3.bf16.msra.mxu1 %v1560_v24 }
  0x51   : > { %1422 = vmatprep.subr.bf16.mxu0 %v1561_v25  ;;  %1488 = vmatprep.subr.bf16.mxu1 %v1561_v25 }
  0x54   : > { %1423 = vmatpush3.bf16.msra.mxu0 %v1561_v25  ;;  %1496 = vmatpush3.bf16.msra.mxu1 %v1561_v25 }
  0x55   : > { %1424 = vmatprep.subr.bf16.mxu0 %v1562_v26  ;;  %1489 = vmatprep.subr.bf16.mxu1 %v1562_v26 }
  0x58   : > { %1425 = vmatpush3.bf16.msra.mxu0 %v1562_v26  ;;  %1497 = vmatpush3.bf16.msra.mxu1 %v1562_v26 }
  0x5b   : > { %1427 = vmatmul.mubr.bf16.vlgmr.msra.gmra.mxu0 %v1565_v27  ;;  %1435 = vmatmul.mubr.bf16.vlgmr.msra.gmra.mxu1 %v1566_v28 }
  0x5c   : > { %1430 = vmatprep.mubr.bf16.mxu0 %v1567_v29  ;;  %1438 = vmatprep.mubr.bf16.mxu1 %v1568_v30 }
  0x63   : > { %1431 = vmatmul.mubr.bf16.gmra.mxu0 %v1569_v31  ;;  %1439 = vmatmul.mubr.bf16.gmra.mxu1 %v1570_v32 }
 0x11b   : > { %v1428_v35 = vpop.f32.mrf.mxu0  ;;  %v1436_v36 = vpop.f32.mrf.mxu1 }
 0x11c   : > { %v683_v39 = vadd.f32 %v1428_v35, %v442_v33  ;;  %v691_v40 = vadd.f32 %v1436_v36, %v450_v34 }
 0x11d   : > { %v618_v41 = vpop.f32.mrf.mxu0  ;;  %v650_v42 = vpop.f32.mrf.mxu1 }
 0x11e   : > { %700 = vst.msk [vmem:[#allocation2 + $0x10] sm:$0xff] %vm697_vm1, %v683_v39  ;;  %708 = vst.msk [vmem:[#allocation2 + $0x50] sm:$0xff] %vm697_vm1, %v691_v40  ;;  %v681_v45 = vadd.f32 %v618_v41, %v440_v37  ;;  %v689_v46 = vadd.f32 %v650_v42, %v448_v38 }
 0x11f   : > { %v1429_v47 = vpop.f32.mrf.mxu0  ;;  %v1437_v48 = vpop.f32.mrf.mxu1 }
 0x120   : > { %698 = vst.msk [vmem:[#allocation2] sm:$0xff] %vm697_vm1, %v681_v45  ;;  %706 = vst.msk [vmem:[#allocation2 + $0x40] sm:$0xff] %vm697_vm1, %v689_v46  ;;  %v684_v51 = vadd.f32 %v1429_v47, %v443_v43  ;;  %v692_v52 = vadd.f32 %v1437_v48, %v451_v44 }
 0x121   : > { %v621_v53 = vpop.f32.mrf.mxu0  ;;  %v653_v54 = vpop.f32.mrf.mxu1 }
 0x122   : > { %701 = vst.msk [vmem:[#allocation2 + $0x18] sm:$0xff] %vm697_vm1, %v684_v51  ;;  %709 = vst.msk [vmem:[#allocation2 + $0x58] sm:$0xff] %vm697_vm1, %v692_v52  ;;  %v682_v57 = vadd.f32 %v621_v53, %v441_v49  ;;  %v690_v58 = vadd.f32 %v653_v54, %v449_v50 }
 0x123   : > { %v1432_v59 = vpop.f32.mrf.mxu0  ;;  %v1440_v60 = vpop.f32.mrf.mxu1 }
 0x124   : > { %699 = vst.msk [vmem:[#allocation2 + $0x8] sm:$0xff] %vm697_vm1, %v682_v57  ;;  %707 = vst.msk [vmem:[#allocation2 + $0x48] sm:$0xff] %vm697_vm1, %v690_v58  ;;  %v687_v63 = vadd.f32 %v1432_v59, %v446_v55  ;;  %v695_v0 = vadd.f32 %v1440_v60, %v454_v56 }
 0x125   : > { %v634_v1 = vpop.f32.mrf.mxu0  ;;  %v666_v2 = vpop.f32.mrf.mxu1 }
 0x126   : > { %704 = vst.msk [vmem:[#allocation2 + $0x30] sm:$0xff] %vm697_vm1, %v687_v63  ;;  %712 = vst.msk [vmem:[#allocation2 + $0x70] sm:$0xff] %vm697_vm1, %v695_v0  ;;  %v685_v5 = vadd.f32 %v634_v1, %v444_v61  ;;  %v693_v6 = vadd.f32 %v666_v2, %v452_v62 }
 0x127   : > { %v1433_v7 = vpop.f32.mrf.mxu0  ;;  %v1441_v8 = vpop.f32.mrf.mxu1 }
 0x128   : > { %702 = vst.msk [vmem:[#allocation2 + $0x20] sm:$0xff] %vm697_vm1, %v685_v5  ;;  %710 = vst.msk [vmem:[#allocation2 + $0x60] sm:$0xff] %vm697_vm1, %v693_v6  ;;  %v688_v11 = vadd.f32 %v1433_v7, %v447_v3  ;;  %v696_v12 = vadd.f32 %v1441_v8, %v455_v4  ;;  %717 = sbr.rel (%p1309_p13) target bundleno = 541 (0x21d), region = 93 }
 0x129   : > { %v637_v13 = vpop.f32.mrf.mxu0  ;;  %v669_v14 = vpop.f32.mrf.mxu1 }
 0x12a   : > { %705 = vst.msk [vmem:[#allocation2 + $0x38] sm:$0xff] %vm697_vm1, %v688_v11  ;;  %713 = vst.msk [vmem:[#allocation2 + $0x78] sm:$0xff] %vm697_vm1, %v696_v12  ;;  %v686_v15 = vadd.f32 %v637_v13, %v445_v9  ;;  %v694_v16 = vadd.f32 %v669_v14, %v453_v10 }
 0x12c   : > { %703 = vst.msk [vmem:[#allocation2 + $0x28] sm:$0xff] %vm697_vm1, %v686_v15  ;;  %711 = vst.msk [vmem:[#allocation2 + $0x68] sm:$0xff] %vm697_vm1, %v694_v16 }
 0x12d   : > { %v1571_v17 = vld [vmem:[%s1939_s4 + $0x8] sm:$0xff]   ;;  %v1573_v19 = vld [vmem:[%s1939_s4] sm:$0xff]   ;;  %v720_v26 = vld [vmem:[#allocation2 + $0x10] sm:$0xff]  ;;  %vm1159_vm2 = vcmask 257024  }
 0x12e   : > { %v1572_v18 = vld [vmem:[%s1938_s3 + $0x8] sm:$0xff]   ;;  %1442 = vmatprep.subr.bf16.mxu0 %v1571_v17  ;;  %v1574_v20 = vld [vmem:[%s1938_s3] sm:$0xff]   ;;  %v721_v27 = vld [vmem:[#allocation2 + $0x18] sm:$0xff] }
 0x12f   : > { %1462 = vmatprep.subr.bf16.mxu1 %v1572_v18  ;;  %1443 = vmatpush3.bf16.msra.mxu0 %v1571_v17  ;;  %v1575_v21 = vld [vmem:[%s1766_s17] sm:$0xff]   ;;  %v719_v23 = vld [vmem:[#allocation2 + $0x8] sm:$0xff]  ;;  %v735_v28 = vpack.c.bf16 %v721_v27, %v720_v26  ;;  %v1577_v29 = vld [vmem:[%s1766_s17 + $0x10] sm:$0xff]  }
 0x130   : > { %1463 = vmatpush3.bf16.msra.mxu1 %v1572_v18  ;;  %1444 = vmatprep.subr.bf16.mxu0 %v1573_v19  ;;  %v718_v22 = vld [vmem:[#allocation2] sm:$0xff]  ;;  %v1576_v25 = vld [vmem:[%s1766_s17 + $0x8] sm:$0xff]   ;;  %v724_v33 = vld [vmem:[#allocation2 + $0x30] sm:$0xff] }
 0x131   : > { %1464 = vmatprep.subr.bf16.mxu1 %v1574_v20  ;;  %1446 = vmatprep.mubr.msk.bf16.mxu0 %vm697_vm1, %v1575_v21  ;;  %v734_v24 = vpack.c.bf16 %v719_v23, %v718_v22  ;;  %v722_v30 = vld [vmem:[#allocation2 + $0x20] sm:$0xff]  ;;  %v725_v34 = vld [vmem:[#allocation2 + $0x38] sm:$0xff]  ;;  %v727_v36 = vld [vmem:[#allocation2 + $0x48] sm:$0xff] }
 0x132   : > { %v726_v35 = vld [vmem:[#allocation2 + $0x40] sm:$0xff]  ;;  %v1578_v37 = vld [vmem:[%s1766_s17 + $0x18] sm:$0xff]   ;;  %v737_v38 = vpack.c.bf16 %v725_v34, %v724_v33  ;;  %v728_v41 = vld [vmem:[#allocation2 + $0x50] sm:$0xff] }
 0x133   : > { %1445 = vmatpush3.bf16.msra.mxu0 %v1573_v19  ;;  %1466 = vmatprep.mubr.msk.bf16.mxu1 %vm697_vm1, %v734_v24  ;;  %v723_v31 = vld [vmem:[#allocation2 + $0x28] sm:$0xff]  ;;  %v1579_v39 = vld [vmem:[%s1766_s17 + $0x20] sm:$0xff]   ;;  %v738_v40 = vpack.c.bf16 %v727_v36, %v726_v35  ;;  %v729_v42 = vld [vmem:[#allocation2 + $0x58] sm:$0xff] }
 0x134   : > { %1465 = vmatpush3.bf16.msra.mxu1 %v1574_v20  ;;  %v736_v32 = vpack.c.bf16 %v723_v31, %v722_v30  ;;  %v730_v43 = vld [vmem:[#allocation2 + $0x60] sm:$0xff]  ;;  %v731_v44 = vld [vmem:[#allocation2 + $0x68] sm:$0xff]  ;;  %v739_v46 = vpack.c.bf16 %v729_v42, %v728_v41  ;;  %v1581_v47 = vld [vmem:[%s1766_s17 + $0x30] sm:$0xff]  }
 0x135   : > { %v1580_v45 = vld [vmem:[%s1766_s17 + $0x28] sm:$0xff]   ;;  %v740_v48 = vpack.c.bf16 %v731_v44, %v730_v43  ;;  %v732_v49 = vld [vmem:[#allocation2 + $0x70] sm:$0xff]  ;;  %v733_v50 = vld [vmem:[#allocation2 + $0x78] sm:$0xff] }
 0x136   : > { %1447 = vmatmul.mubr.msk.bf16.vlgmr.msra.gmra.mxu0 %vm697_vm1, %v1576_v25  ;;  %v1582_v51 = vld [vmem:[%s1766_s17 + $0x38] sm:$0xff]   ;;  %v741_v52 = vpack.c.bf16 %v733_v50, %v732_v49  ;;  %v1864_v55 = vld [vmem:[%s1940_s5] ss:$0 sm:$0xff] }
 0x137   : > { %1467 = vmatmul.mubr.msk.bf16.vlgmr.msra.gmra.mxu1 %vm697_vm1, %v735_v28  ;;  %1450 = vmatprep.mubr.msk.bf16.mxu0 %vm697_vm1, %v1577_v29 }
 0x138   : > { %1470 = vmatprep.mubr.msk.bf16.mxu1 %vm697_vm1, %v736_v32 }
 0x13e   : > { %1451 = vmatmul.mubr.msk.bf16.gmra.mxu0 %vm697_vm1, %v1578_v37 }
 0x13f   : > { %1471 = vmatmul.mubr.msk.bf16.gmra.mxu1 %vm697_vm1, %v737_v38  ;;  %1454 = vmatprep.mubr.msk.bf16.mxu0 %vm697_vm1, %v1579_v39 }
 0x140   : > { %1474 = vmatprep.mubr.msk.bf16.mxu1 %vm697_vm1, %v738_v40 }
 0x146   : > { %1455 = vmatmul.mubr.msk.bf16.gmra.mxu0 %vm697_vm1, %v1580_v45 }
 0x147   : > { %1475 = vmatmul.mubr.msk.bf16.gmra.mxu1 %vm697_vm1, %v739_v46  ;;  %1458 = vmatprep.mubr.msk.bf16.mxu0 %vm697_vm1, %v1581_v47 }
 0x148   : > { %1478 = vmatprep.mubr.msk.bf16.mxu1 %vm697_vm1, %v740_v48 }
 0x14e   : > { %1459 = vmatmul.mubr.msk.bf16.gmra.mxu0 %vm697_vm1, %v1582_v51 }
 0x14f   : > { %1479 = vmatmul.mubr.msk.bf16.gmra.mxu1 %vm697_vm1, %v741_v52 }
 0x1f6   : > { %v1448_v53 = vpop.f32.mrf.mxu0 }
 0x1f7   : > { %v1468_v54 = vpop.f32.mrf.mxu1 }
 0x1f8   : > { %v1018_v56 = vadd.f32 %v1468_v54, %v1448_v53  ;;  %v876_v57 = vpop.f32.mrf.mxu0 }
 0x1f9   : > { %v1009_v58 = vpop.f32.mrf.mxu1 }
 0x1fa   : > { %v1081_v59 = vadd.f32 %v1864_v55, %v1018_v56  ;;  %v1010_v60 = vadd.f32 %v1009_v58, %v876_v57  ;;  %v1449_v61 = vpop.f32.mrf.mxu0 }
 0x1fb   : > { %v1469_v62 = vpop.f32.mrf.mxu1 }
 0x1fc   : > { %v1360_v63 = vpack.c.bf16 %v1081_v59, %v1081_v59  ;;  %v1079_v0 = vadd.f32 %v1864_v55, %v1010_v60  ;;  %v1021_v1 = vadd.f32 %v1469_v62, %v1449_v61  ;;  %v879_v2 = vpop.f32.mrf.mxu0 }
 0x1fd   : > { %v1012_v3 = vpop.f32.mrf.mxu1 }
 0x1fe   : > { %1162 = vst.msk [vmem:[%s1771_s19 + $0x8] sm:$0xf] %vm1159_vm2, %v1360_v63  ;;  %v1358_v4 = vpack.c.bf16 %v1079_v0, %v1079_v0  ;;  %v1082_v5 = vadd.f32 %v1864_v55, %v1021_v1  ;;  %v1013_v6 = vadd.f32 %v1012_v3, %v879_v2  ;;  %v1452_v7 = vpop.f32.mrf.mxu0 }
 0x1ff   : > { %v1472_v8 = vpop.f32.mrf.mxu1 }
 0x200   : > { %1160 = vst.msk [vmem:[%s1771_s19] sm:$0xf] %vm1159_vm2, %v1358_v4  ;;  %v1361_v9 = vpack.c.bf16 %v1082_v5, %v1082_v5  ;;  %v1080_v10 = vadd.f32 %v1864_v55, %v1013_v6  ;;  %v1034_v11 = vadd.f32 %v1472_v8, %v1452_v7  ;;  %v892_v12 = vpop.f32.mrf.mxu0 }
 0x201   : > { %v1025_v13 = vpop.f32.mrf.mxu1 }
 0x202   : > { %1163 = vst.msk [vmem:[%s1771_s19 + $0xc] sm:$0xf] %vm1159_vm2, %v1361_v9  ;;  %v1359_v14 = vpack.c.bf16 %v1080_v10, %v1080_v10  ;;  %v1085_v15 = vadd.f32 %v1864_v55, %v1034_v11  ;;  %v1026_v16 = vadd.f32 %v1025_v13, %v892_v12  ;;  %v1453_v17 = vpop.f32.mrf.mxu0 }
 0x203   : > { %v1473_v18 = vpop.f32.mrf.mxu1 }
 0x204   : > { %1161 = vst.msk [vmem:[%s1771_s19 + $0x4] sm:$0xf] %vm1159_vm2, %v1359_v14  ;;  %v1364_v19 = vpack.c.bf16 %v1085_v15, %v1085_v15  ;;  %v1083_v20 = vadd.f32 %v1864_v55, %v1026_v16  ;;  %v1037_v21 = vadd.f32 %v1473_v18, %v1453_v17  ;;  %v895_v22 = vpop.f32.mrf.mxu0 }
 0x205   : > { %v1028_v23 = vpop.f32.mrf.mxu1 }
 0x206   : > { %1166 = vst.msk [vmem:[%s1771_s19 + $0x18] sm:$0xf] %vm1159_vm2, %v1364_v19  ;;  %v1362_v24 = vpack.c.bf16 %v1083_v20, %v1083_v20  ;;  %v1086_v25 = vadd.f32 %v1864_v55, %v1037_v21  ;;  %v1029_v26 = vadd.f32 %v1028_v23, %v895_v22  ;;  %v1456_v27 = vpop.f32.mrf.mxu0 }
 0x207   : > { %v1476_v28 = vpop.f32.mrf.mxu1 }
 0x208   : > { %1164 = vst.msk [vmem:[%s1771_s19 + $0x10] sm:$0xf] %vm1159_vm2, %v1362_v24  ;;  %v1365_v29 = vpack.c.bf16 %v1086_v25, %v1086_v25  ;;  %v1084_v30 = vadd.f32 %v1864_v55, %v1029_v26  ;;  %v1050_v31 = vadd.f32 %v1476_v28, %v1456_v27  ;;  %v908_v32 = vpop.f32.mrf.mxu0 }
 0x209   : > { %v1041_v33 = vpop.f32.mrf.mxu1 }
 0x20a   : > { %1167 = vst.msk [vmem:[%s1771_s19 + $0x1c] sm:$0xf] %vm1159_vm2, %v1365_v29  ;;  %v1363_v34 = vpack.c.bf16 %v1084_v30, %v1084_v30  ;;  %v1089_v35 = vadd.f32 %v1864_v55, %v1050_v31  ;;  %v1042_v36 = vadd.f32 %v1041_v33, %v908_v32  ;;  %v1457_v37 = vpop.f32.mrf.mxu0 }
 0x20b   : > { %v1477_v38 = vpop.f32.mrf.mxu1 }
 0x20c   : > { %1165 = vst.msk [vmem:[%s1771_s19 + $0x14] sm:$0xf] %vm1159_vm2, %v1363_v34  ;;  %v1368_v39 = vpack.c.bf16 %v1089_v35, %v1089_v35  ;;  %v1087_v40 = vadd.f32 %v1864_v55, %v1042_v36  ;;  %v1053_v41 = vadd.f32 %v1477_v38, %v1457_v37  ;;  %v911_v42 = vpop.f32.mrf.mxu0 }
 0x20d   : > { %v1044_v43 = vpop.f32.mrf.mxu1 }
 0x20e   : > { %1170 = vst.msk [vmem:[%s1771_s19 + $0x28] sm:$0xf] %vm1159_vm2, %v1368_v39  ;;  %v1366_v44 = vpack.c.bf16 %v1087_v40, %v1087_v40  ;;  %v1090_v45 = vadd.f32 %v1864_v55, %v1053_v41  ;;  %v1045_v46 = vadd.f32 %v1044_v43, %v911_v42  ;;  %v1460_v47 = vpop.f32.mrf.mxu0 }
 0x20f   : > { %v1480_v48 = vpop.f32.mrf.mxu1 }
 0x210   : > { %1168 = vst.msk [vmem:[%s1771_s19 + $0x20] sm:$0xf] %vm1159_vm2, %v1366_v44  ;;  %v1369_v49 = vpack.c.bf16 %v1090_v45, %v1090_v45  ;;  %v1088_v50 = vadd.f32 %v1864_v55, %v1045_v46  ;;  %v1066_v51 = vadd.f32 %v1480_v48, %v1460_v47  ;;  %v924_v52 = vpop.f32.mrf.mxu0 }
 0x211   : > { %v1057_v53 = vpop.f32.mrf.mxu1 }
 0x212   : > { %1171 = vst.msk [vmem:[%s1771_s19 + $0x2c] sm:$0xf] %vm1159_vm2, %v1369_v49  ;;  %v1367_v54 = vpack.c.bf16 %v1088_v50, %v1088_v50  ;;  %v1093_v56 = vadd.f32 %v1864_v55, %v1066_v51  ;;  %v1058_v57 = vadd.f32 %v1057_v53, %v924_v52  ;;  %v1461_v58 = vpop.f32.mrf.mxu0 }
 0x213   : > { %v1481_v59 = vpop.f32.mrf.mxu1 }
 0x214   : > { %1169 = vst.msk [vmem:[%s1771_s19 + $0x24] sm:$0xf] %vm1159_vm2, %v1367_v54  ;;  %v1372_v60 = vpack.c.bf16 %v1093_v56, %v1093_v56  ;;  %v1091_v61 = vadd.f32 %v1864_v55, %v1058_v57  ;;  %v1069_v62 = vadd.f32 %v1481_v59, %v1461_v58  ;;  %v927_v63 = vpop.f32.mrf.mxu0 }
 0x215   : > { %v1060_v0 = vpop.f32.mrf.mxu1 }
 0x216   : > { %1174 = vst.msk [vmem:[%s1771_s19 + $0x38] sm:$0xf] %vm1159_vm2, %v1372_v60  ;;  %v1370_v1 = vpack.c.bf16 %v1091_v61, %v1091_v61  ;;  %v1094_v2 = vadd.f32 %v1864_v55, %v1069_v62  ;;  %v1061_v3 = vadd.f32 %v1060_v0, %v927_v63 }
 0x218   : > { %1172 = vst.msk [vmem:[%s1771_s19 + $0x30] sm:$0xf] %vm1159_vm2, %v1370_v1  ;;  %v1373_v4 = vpack.c.bf16 %v1094_v2, %v1094_v2  ;;  %v1092_v5 = vadd.f32 %v1864_v55, %v1061_v3 }
 0x21a   : > { %1175 = vst.msk [vmem:[%s1771_s19 + $0x3c] sm:$0xf] %vm1159_vm2, %v1373_v4  ;;  %v1371_v6 = vpack.c.bf16 %v1092_v5, %v1092_v5 }
 0x21c   : > { %1173 = vst.msk [vmem:[%s1771_s19 + $0x34] sm:$0xf] %vm1159_vm2, %v1371_v6 }
 0x21d PF: > { %s16_s27 = sadd.s32 1, %s1637_s27   ;;  %s1942_s21 = smov %s1617_s22 }
 0x21e   : > { %p13_p0 = scmp.ge.s32.totalorder %s16_s27, 6   ;;  %s1943_s22 = smov %s1726_s10 }
 0x21f   : > { %s1944_s23 = smov %s1629_s25  ;;  %s1945_s24 = smov %s1633_s26 }
 0x220   : > { %s1946_s25 = smov %s1949_s28  ;;  %s1947_s26 = smov %s1953_s29 }
 0x221   :  { %15 = sbr.rel (!%p13_p0) target bundleno = 4 (0x4), region = 134 }

// kernel: model_forward.9
= control target key start
LH: loop header
LB: loop body
LE: loop exit
PB: predicated region body
PF: predicated region fallthrough
CT: control target
= control target key end

     0   :  { %s1006_s0 = inlined_call_operand.vmem [shape: bf16[32,384], index: 0, kind: input, shape index: {}]   ;;  %s1007_s1 = inlined_call_operand.vmem [shape: bf16[32,384], index: 1, kind: input, shape index: {}]   ;;  %s1008_s2 = inlined_call_operand.vmem [shape: bf16[32,32], index: 2, kind: input, shape index: {}]   ;;  %s1009_s3 = inlined_call_operand.vmem [shape: bf16[32,32], index: 3, kind: input, shape index: {}]   ;;  %s1010_s4 = inlined_call_operand.vmem [shape: f32[32,1], index: 4, kind: input, shape index: {}]   ;;  %s1011_s5 = inlined_call_operand.vmem [shape: bf16[1,32], index: 5, kind: input, shape index: {}]   ;;  %s1012_s6 = inlined_call_operand.<no memory space> [shape: f32[1,1], index: 6, kind: input, shape index: {}]   ;;  %s1013_s7 = inlined_call_operand.vmem [shape: f32[1,384], index: 7, kind: output, shape index: {}]  }
   0x1   :  { %v12_v0 = vstv %s1012_s6 }
   0x2   :  { %13 = vst [vmem:[#allocation2] sm:$0x1] %v12_v0 }
   0x3   :  { %s907_s26 = smov 0   ;;  %s909_s27 = smov 0  }
   0x4   :  { %s911_s28 = smov 0  }
   0x5 LB: > { %s739_s6 = sadd.s32 4294967295, %s859_s28   ;;  %s924_s29 = sadd.s32 1, %s859_s28   ;;  %s859_s28 = sphi %s911_s28, %s1017_s28   ;;  %s855_s27 = sphi %s909_s27, %s1016_s27   ;;  %s851_s26 = sphi %s907_s26, %s1015_s26  }
   0x6   : > { %s23_s30 = ssub.s32 %s859_s28, %s924_s29  ;;  %s26_s8 = sadd.s32 1, %s855_s27 }
   0x7   : > { %p24_p0 = scmp.eq.s32.totalorder %s23_s30, 0  ;;  %p33_p1 = scmp.ne.s32.totalorder %s855_s27, %s851_s26 }
   0x8   : > { %p34_p2 = scmp.eq.s32.totalorder %s859_s28, 0  ;;  %p742_p4 = scmp.ge.s32.totalorder %s859_s28, 3 }
   0x9   : > { %s933_s9 = scalar_select %p24_p0, %s855_s27, %s26_s8  }
   0xa   : > { %p935_p3 = por %p34_p2, %p33_p1  ;;  %231 = sbr.rel (%p742_p4) target bundleno = 27 (0x1b), region = 36 }
   0xf   : > { %234 = sbr.rel (!%p935_p3) target bundleno = 21 (0x15), region = 40  ;;  %s236_s11 = sand.u32 (%p935_p3), 1, %s855_s27  }
  0x10   : > { %s744_s12 = sshll.u32 (%p935_p3), %s859_s28, 2  ;;  %s743_s13 = sshll.u32 (%p935_p3), %s236_s11, 4 }
  0x11   : > { %s240_s16 = scalar_lea.vmem (%p935_p3), %s1006_s0, %s744_s12  ;;  %s238_s17 = scalar_lea.vmem (%p935_p3), [#allocation3], %s743_s13 }
  0x12   : > { %v257_v1 = vld [vmem:[%s240_s16] sm:$0xf] (%p935_p3)  ;;  %v259_v2 = vld [vmem:[%s240_s16 + $0xc] sm:$0xf] (%p935_p3)  ;;  %v261_v3 = vld [vmem:[%s240_s16 + $0x18] sm:$0xf] (%p935_p3) }
  0x13   : > { %258 = vst [vmem:[%s238_s17] sm:$0xf] (%p935_p3), %v257_v1  ;;  %260 = vst [vmem:[%s238_s17 + $0x4] sm:$0xf] (%p935_p3), %v259_v2  ;;  %v263_v4 = vld [vmem:[%s240_s16 + $0x24] sm:$0xf] (%p935_p3) }
  0x14   : > { %262 = vst [vmem:[%s238_s17 + $0x8] sm:$0xf] %v261_v3  ;;  %264 = vst [vmem:[%s238_s17 + $0xc] sm:$0xf] %v263_v4 }
  0x15 PF: > { %296 = sbr.rel (!%p935_p3) target bundleno = 27 (0x1b), region = 81  ;;  %s298_s18 = sand.u32 (%p935_p3), 1, %s855_s27  }
  0x16   : > { %s746_s19 = sshll.u32 (%p935_p3), %s859_s28, 2  ;;  %s745_s20 = sshll.u32 (%p935_p3), %s298_s18, 4 }
  0x17   : > { %s302_s23 = scalar_lea.vmem (%p935_p3), %s1007_s1, %s746_s19  ;;  %s300_s24 = scalar_lea.vmem (%p935_p3), [#allocation4], %s745_s20 }
  0x18   : > { %v319_v5 = vld [vmem:[%s302_s23] sm:$0xf] (%p935_p3)  ;;  %v321_v6 = vld [vmem:[%s302_s23 + $0xc] sm:$0xf] (%p935_p3)  ;;  %v323_v7 = vld [vmem:[%s302_s23 + $0x18] sm:$0xf] (%p935_p3) }
  0x19   : > { %320 = vst [vmem:[%s300_s24] sm:$0xf] (%p935_p3), %v319_v5  ;;  %322 = vst [vmem:[%s300_s24 + $0x4] sm:$0xf] (%p935_p3), %v321_v6  ;;  %v325_v8 = vld [vmem:[%s302_s23 + $0x24] sm:$0xf] (%p935_p3) }
  0x1a   : > { %324 = vst [vmem:[%s300_s24 + $0x8] sm:$0xf] %v323_v7  ;;  %326 = vst [vmem:[%s300_s24 + $0xc] sm:$0xf] %v325_v8 }
  0x1b PF: > { %p747_p5 = scmp.ge.s32.totalorder %s859_s28, 1  ;;  %p357_p6 = scmp.lt.s32.totalorder %s859_s28, 4 }
  0x1d   : > { %p358_p7 = pnand %p747_p5, %p357_p6 }
  0x1e   : > { %s364_s25 = sand.u32 (!%p358_p7), 1, %s851_s26   ;;  %p404_p8 = scmp.lt.s32.totalorder (!%p358_p7), %s739_s6, 2 }
  0x1f   : > { %361 = sbr.rel (%p358_p7) target bundleno = 459 (0x1cb), region = 122  ;;  %s748_s10 = sshll.u32 (!%p358_p7), %s364_s25, 4 }
  0x20   : > { %s373_s13 = scalar_lea.vmem (!%p358_p7), [#allocation4], %s748_s10  ;;  %s366_s14 = scalar_lea.vmem (!%p358_p7), [#allocation3], %s748_s10 }
  0x24   : > { %v833_v9 = vld [vmem:[%s1009_s3] sm:$0xff]   ;;  %vm446_vm0 = vcmask 261120   ;;  %v861_v13 = vmov 0   ;;  %v581_v16 = vld [vmem:[%s1010_s4 + $0x10] sm:$0xff]  ;;  %v835_v17 = vld [vmem:[%s1009_s3 + $0x8] sm:$0xff]   ;;  %v862_v23 = vmov 0.0   ;;  %v620_v51 = vlaneseq }
  0x25   : > { %780 = vmatprep.mubr.msk.bf16.mxu0 %vm446_vm0, %v833_v9  ;;  %v834_v10 = vld [vmem:[%s1008_s2] sm:$0xff]   ;;  %827 = vset.pattern.permute.xlu0 %v861_v13  ;;  %v836_v19 = vld [vmem:[%s1008_s2 + $0x8] sm:$0xff]   ;;  %v582_v20 = vld [vmem:[%s1010_s4 + $0x18] sm:$0xff]  ;;  %vm863_vm1 = vmmov 0   ;;  %s1019_s6 = smov (!%p404_p8, %s739_s6), 2 }
  0x26   : > { %v829_v11 = vld [vmem:[%s373_s13 + $0x8] sm:$0xff]   ;;  %788 = vmatprep.mubr.msk.bf16.mxu1 %vm446_vm0, %v834_v10  ;;  %v831_v14 = vld [vmem:[%s373_s13] sm:$0xff]   ;;  %828 = vset.pattern.permute.xlu1 %v861_v13  ;;  %v621_v52 = vshrl.u32 %v620_v51, 7  ;;  %s406_s12 = scalar_lea.vmem %s1013_s7, %s1019_s6 }
  0x27   : > { %v830_v12 = vld [vmem:[%s366_s14 + $0x8] sm:$0xff]   ;;  %776 = vmatprep.subr.bf16.mxu0 %v829_v11  ;;  %v832_v15 = vld [vmem:[%s366_s14] sm:$0xff]   ;;  %595 = vperm.xlu0 %827, %v581_v16  }
  0x28   : > { %784 = vmatprep.subr.bf16.mxu1 %v830_v12  ;;  %777 = vmatpush3.bf16.msra.mxu0 %v829_v11  ;;  %v579_v18 = vld [vmem:[%s1010_s4] sm:$0xff]  ;;  %v580_v21 = vld [vmem:[%s1010_s4 + $0x8] sm:$0xff]  ;;  %v622_v53 = vsub.s32 0, %v621_v52 }
  0x29   : > { %785 = vmatpush3.bf16.msra.mxu1 %v830_v12  ;;  %778 = vmatprep.subr.bf16.mxu0 %v831_v14  ;;  %v614_v22 = vld [vmem:[#allocation2] sm:$0x1] }
  0x2a   : > { %786 = vmatprep.subr.bf16.mxu1 %v832_v15  ;;  %585 = vperm.xlu1 %828, %v579_v18   ;;  %v613_v50 = vld [vmem:[%s1011_s5] sm:$0x1] }
  0x2b   : > { %600 = vperm.xlu0 %827, %v582_v20  }
  0x2c   : > { %779 = vmatpush3.bf16.msra.mxu0 %v831_v14 }
  0x2d   : > { %787 = vmatpush3.bf16.msra.mxu1 %v832_v15  ;;  %792 = vmatprep.subr.bf16.mxu0 %v862_v23 }
  0x2e   : > { %590 = vperm.xlu1 %828, %v580_v21  }
  0x2f   : > { %781 = vmatmul.mubr.msk.bf16.vlgmr.msra.gmra.mxu0 %vm446_vm0, %v835_v17  ;;  %617 = vperm.xlu0 %827, %v614_v22  }
  0x30   : > { %789 = vmatmul.mubr.msk.bf16.vlgmr.msra.gmra.mxu1 %vm446_vm0, %v836_v19  ;;  %796 = vmatprep.mubr.msk.bf16.mxu0 %vm863_vm1, %v862_v23 }
  0xa2   : > { %v596_v25 = vpop.permute.xlu0 %595 }
  0xa5   : > { %v586_v29 = vpop.permute.xlu1 %585 }
  0xa6   : > { %v601_v37 = vpop.permute.xlu0 %600 }
  0xa9   : > { %v591_v41 = vpop.permute.xlu1 %590 }
  0xaa   : > { %v618_v54 = vpop.permute.xlu0 %617 }
  0xab   : > { %v623_v55 = vrot.slane %v618_v54, %v622_v53 }
  0xef   : > { %v782_v24 = vpop.f32.mrf.mxu0 }
  0xf0   : > { %v790_v26 = vpop.f32.mrf.mxu1 }
  0xf1   : > { %v573_v27 = vadd.f32 %v790_v26, %v782_v24  ;;  %v487_v28 = vpop.f32.mrf.mxu0 }
  0xf2   : > { %v564_v30 = vpop.f32.mrf.mxu1 }
  0xf3   : > { %v783_v31 = vpop.f32.mrf.mxu0  ;;  %v605_v33 = vadd.f32 %v596_v25, %v573_v27  ;;  %v565_v34 = vadd.f32 %v564_v30, %v487_v28 }
  0xf4   : > { %v791_v32 = vpop.f32.mrf.mxu1 }
  0xf5   : > { %v576_v35 = vadd.f32 %v791_v32, %v783_v31  ;;  %v490_v36 = vpop.f32.mrf.mxu0  ;;  %v609_v42 = vmax.f32 %v605_v33, 0.0  ;;  %v603_v43 = vadd.f32 %v586_v29, %v565_v34 }
  0xf6   : > { %v567_v38 = vpop.f32.mrf.mxu1 }
  0xf7   : > { %v606_v39 = vadd.f32 %v601_v37, %v576_v35  ;;  %v568_v40 = vadd.f32 %v567_v38, %v490_v36  ;;  %v607_v48 = vmax.f32 %v603_v43, 0.0 }
  0xf9   : > { %v610_v44 = vmax.f32 %v606_v39, 0.0  ;;  %v604_v45 = vadd.f32 %v591_v41, %v568_v40 }
  0xfb   : > { %v612_v46 = vpack.c.bf16 %v610_v44, %v609_v42  ;;  %v608_v47 = vmax.f32 %v604_v45, 0.0 }
  0xfd   : > { %793 = vmatpush3.bf16.msra.mxu0 %v612_v46  ;;  %v611_v49 = vpack.c.bf16 %v608_v47, %v607_v48 }
  0xfe   : > { %794 = vmatprep.subr.bf16.mxu0 %v862_v23 }
 0x101   : > { %795 = vmatpush3.bf16.msra.mxu0 %v611_v49 }
 0x104   : > { %797 = vmatmul.mubr.msk.bf16.vlgmr.msra.gmra.mxu0 %vm446_vm0, %v613_v50 }
 0x1c4   : > { %v661_v56 = vpop.f32.mrf.mxu0 }
 0x1c5   : > { %v662_v57 = vadd.f32 %v661_v56, %v623_v55 }
 0x1c6   : > { %v798_v58 = vpop.f32.mrf.mxu0 }
 0x1c7   : > { %667 = vst [vmem:[%s406_s12] sm:$0x1] %v662_v57 }
 0x1c8   : > { %v664_v59 = vpop.f32.mrf.mxu0 }
 0x1ca   : > { %v799_v60 = vpop.f32.mrf.mxu0 }
 0x1cb PF: > { %p16_p9 = scmp.ge.s32.totalorder %s924_s29, 5   ;;  %s1015_s26 = smov %s855_s27 }
 0x1cc   : > { %s1016_s27 = smov %s933_s9  ;;  %s1017_s28 = smov %s924_s29 }
 0x1cd   :  { %18 = sbr.rel (!%p16_p9) target bundleno = 5 (0x5), region = 173 }

</bundles_post_ra>
